<compile_context>
chip_gen: v7x
topology: tpu7x:2x2x1
jax: 0.10.0
libtpu: 0.0.40
codegen_flags: <defaults>
</compile_context>

<pallas_src>
import functools

import jax
import jax.numpy as jnp
from jax.experimental import pallas as pl
from jax.experimental.pallas import tpu as pltpu


def _round_up(x, m):
    return ((x + m - 1) // m) * m


def _vmem_cap_bytes():
    # Generation-aware cap: leave headroom under the physical per-core VMEM
    # (64 MiB on v7x, 128 MiB on v5e/v6e).
    try:
        phys = int(pltpu.get_tpu_info().vmem_capacity_bytes)
    except Exception:  # off-TPU tracing / attribute differences
        phys = 128 << 20
    return max(min(phys - (16 << 20), 112 << 20), 32 << 20)


def _choose_rows_per_block(gh, gw, batch, max_rows, fits):
    """Pick patch-rows per grid step: divisor of gh, sublane-aligned output
    block, within the VMEM budget, and keeping >= 2 grid steps when possible
    (v7x megacore + DMA/compute pipelining)."""
    divs = [d for d in range(1, gh + 1) if gh % d == 0]
    aligned = [d for d in divs if (d * gw) % 8 == 0 or d == gh]
    good = [d for d in aligned if d * gw <= max_rows and fits(d)]
    d = max(good) if good else min(aligned)
    if batch * (gh // d) < 2:
        smaller = [s for s in aligned if s < d and batch * (gh // s) >= 2 and fits(s)]
        if smaller:
            d = max(smaller)
    return d


def prepare_proj(weight, bias, *, compute_dtype=jnp.bfloat16):
    """Pre-arrange Conv2d (E, C, p, p) weights for the fused kernel.

    Hoist this out of the per-call jitted path: call once at model init.
    Feature order of K is (pw, c, ph) so the kernel's in-VMEM shuffle only
    needs a single 2-D transpose per patch row.
    """
    E, C, ph, pw = weight.shape
    assert ph == pw, "square patches only"
    p = ph
    K = C * p * p
    Ep = _round_up(E, 128)
    w_mat = jnp.transpose(weight, (3, 1, 2, 0)).reshape(K, E).astype(compute_dtype)
    w_mat = jnp.pad(w_mat, ((0, 0), (0, Ep - E)))
    b_mat = jnp.pad(bias.astype(jnp.float32).reshape(1, E), ((0, 0), (0, Ep - E)))
    return w_mat, b_mat


def patch_embed_prepared(x, w_mat, b_mat, *, patch_size, embed_dim,
                         compute_dtype=jnp.bfloat16, out_dtype=None,
                         max_rows_per_step=2048):
    """x: (B, C, H, W) NCHW.  w_mat/b_mat from prepare_proj.
    Returns (B, num_patches, embed_dim) in out_dtype (default: compute_dtype)."""
    B, C, H, W = x.shape
    p = patch_size
    E = embed_dim
    assert H % p == 0 and W % p == 0, "image size must be divisible by patch size"
    # TODO(synk): patch sizes that are not multiples of 8 need a different
    # in-kernel shuffle (or an unfused im2col path); not needed for ViT (p=16).
    assert p % 8 == 0, "fused kernel requires patch_size % 8 == 0"

    gh, gw = H // p, W // p
    num_patches = gh * gw
    K = C * p * p
    Cp = C * p
    Ep = w_mat.shape[1]
    assert w_mat.shape == (K, Ep) and Ep >= E
    out_dtype = compute_dtype if out_dtype is None else out_dtype

    x_bytes = jnp.dtype(x.dtype).itemsize
    cmp_bytes = jnp.dtype(compute_dtype).itemsize
    out_bytes = jnp.dtype(out_dtype).itemsize
    w_bytes = K * Ep * cmp_bytes + Ep * 4          # resident, single-buffered

    def per_step_bytes(rows):
        return (2 * C * (rows * p) * W * x_bytes     # double-buffered input slab
                + 2 * (rows * gw) * E * out_bytes    # double-buffered output tile
                + (rows * gw) * K * cmp_bytes        # fused-im2col patch scratch
                + W * Cp * 4)                        # f32 transpose scratch

    cap = _vmem_cap_bytes()

    def fits(rows):
        return w_bytes + per_step_bytes(rows) + (16 << 20) <= cap

    rpb = _choose_rows_per_block(gh, gw, B, max_rows_per_step, fits)
    G = gh // rpb
    Ms = rpb * gw                                    # patch rows per grid step

    vmem_limit = int(min(cap, max(32 << 20, w_bytes + per_step_bytes(rpb) + (16 << 20))))

    def kernel(x_ref, w_ref, b_ref, o_ref, at_ref, lhs_ref):
        # x_ref:  (1, C, rpb*p, W)  input dtype
        # w_ref:  (K, Ep) compute dtype (resident);  b_ref: (1, Ep) f32
        # o_ref:  (1, Ms, E) out dtype
        # at_ref: (W, Cp) f32 scratch; lhs_ref: (Ms, K) compute dtype scratch
        for i in range(rpb):                                   # static unroll
            sub = x_ref[0, :, pl.ds(i * p, p), :].astype(jnp.float32)  # (C,p,W)
            # (C,p,W) -> (Cp,W) is tile-trivial for p % 8 == 0; one 2-D
            # transpose puts the lane axis (w) onto sublanes.
            at_ref[...] = sub.reshape(Cp, W).T                          # (W,Cp)
            for j in range(p):
                # rows w = gj*p + j for all gj -> one patch-column slice.
                rows = at_ref[pl.ds(j, gw, stride=p), :]                # (gw,Cp)
                lhs_ref[pl.ds(i * gw, gw), pl.ds(j * Cp, Cp)] = (
                    rows.astype(compute_dtype))
        acc = jnp.dot(lhs_ref[...], w_ref[...],
                      preferred_element_type=jnp.float32)               # (Ms,Ep)
        acc = acc + b_ref[...]
        if Ep != E:
            acc = acc[:, :E]
        o_ref[0] = acc.astype(o_ref.dtype)

    cost = pl.CostEstimate(
        flops=2 * B * num_patches * K * Ep,
        transcendentals=0,
        bytes_accessed=(B * C * H * W * x_bytes
                        + B * num_patches * E * out_bytes
                        + K * Ep * cmp_bytes + Ep * 4),
    )

    out = pl.pallas_call(
        kernel,
        out_shape=jax.ShapeDtypeStruct((B, num_patches, E), out_dtype),
        grid=(B, G),
        in_specs=[
            # Streamed NCHW slab: one group of rpb patch-rows per step.
            pl.BlockSpec((1, C, rpb * p, W), lambda b, g: (b, 0, g, 0)),
            # Resident weight / bias: constant index_map -> single-buffered.
            pl.BlockSpec((K, Ep), lambda b, g: (0, 0),
                         pipeline_mode=pl.Buffered(1)),
            pl.BlockSpec((1, Ep), lambda b, g: (0, 0),
                         pipeline_mode=pl.Buffered(1)),
        ],
        out_specs=pl.BlockSpec((1, Ms, E), lambda b, g: (b, g, 0)),
        scratch_shapes=[
            pltpu.VMEM((W, Cp), jnp.float32),       # transposed slab
            pltpu.VMEM((Ms, K), compute_dtype),     # fused-im2col patch tile
        ],
        compiler_params=pltpu.CompilerParams(
            dimension_semantics=("parallel", "parallel"),
            vmem_limit_bytes=vmem_limit,
        ),
        cost_estimate=cost,
    )(x, w_mat, b_mat)
    return out


def patch_embed(x, weight, bias, patch_size, *, compute_dtype=jnp.bfloat16,
                out_dtype=None, max_rows_per_step=2048):
    """Convenience wrapper mirroring PatchEmbed.forward:
    x: (B, C, H, W), weight: (E, C, p, p), bias: (E,) -> (B, num_patches, E)."""
    w_mat, b_mat = prepare_proj(weight, bias, compute_dtype=compute_dtype)
    return patch_embed_prepared(x, w_mat, b_mat, patch_size=patch_size,
                                embed_dim=weight.shape[0],
                                compute_dtype=compute_dtype, out_dtype=out_dtype,
                                max_rows_per_step=max_rows_per_step)


if __name__ == "__main__":
    # Small shapes that still exercise the fused path with a multi-step grid:
    # img=128, patch=8, in_chans=4, embed_dim=32 -> gh=gw=16, K=256, E=32.
    B, C, H, W = 2, 4, 128, 128
    patch_size = 8
    embed_dim = 32

    key = jax.random.PRNGKey(0)
    kx, kw, kb = jax.random.split(key, 3)
    x = jax.random.normal(kx, (B, C, H, W), dtype=jnp.float32)
    weight = jax.random.normal(
        kw, (embed_dim, C, patch_size, patch_size), dtype=jnp.float32) * 0.02
    bias = jax.random.normal(kb, (embed_dim,), dtype=jnp.float32) * 0.02

    # Weight prep hoisted out of the per-call jitted path (model-init time).
    w_mat, b_mat = prepare_proj(weight, bias)

    fn = jax.jit(functools.partial(
        patch_embed_prepared, patch_size=patch_size, embed_dim=embed_dim,
        max_rows_per_step=64))  # small tiles -> 4 row-groups x 2 images = 8 steps
    out = jax.block_until_ready(fn(x, w_mat, b_mat))

    # Reference: lax conv with torch Conv2d semantics (f32).
    gh, gw = H // patch_size, W // patch_size
    ref = jax.lax.conv_general_dilated(
        x, weight,
        window_strides=(patch_size, patch_size),
        padding="VALID",
        dimension_numbers=("NCHW", "OIHW", "NCHW"),
    ) + bias.reshape(1, embed_dim, 1, 1)
    ref = ref.reshape(B, embed_dim, gh * gw).transpose(0, 2, 1)

    assert out.shape == (B, gh * gw, embed_dim), out.shape
    assert out.dtype == jnp.bfloat16, out.dtype  # bf16 output by default now
    out_f32 = out.astype(jnp.float32)
    max_err = float(jnp.max(jnp.abs(out_f32 - ref)))
    # bf16 inputs / bf16 output / f32 accumulation vs f32 reference.
    assert jnp.allclose(out_f32, ref, atol=3e-2, rtol=3e-2), max_err

    print("KERNEL_OK")
</pallas_src>

<mosaic_0001>
module attributes {stable_mosaic.version = 11 : i64} {
  func.func @kernel(%arg0: i32, %arg1: i32, %arg2: memref<1x4x32x128xf32, #tpu.memory_space<vmem>>, %arg3: memref<256x128xbf16, #tpu.memory_space<vmem>>, %arg4: memref<1x128xf32, #tpu.memory_space<vmem>>, %arg5: memref<1x64x32xbf16, #tpu.memory_space<vmem>>, %arg6: memref<128x32xf32, #tpu.memory_space<vmem>>, %arg7: memref<64x256xbf16, #tpu.memory_space<vmem>>) attributes {dimension_semantics = [#tpu.dimension_semantics<parallel>, #tpu.dimension_semantics<parallel>], iteration_bounds = array<i64: 2, 4>, scalar_prefetch = 0 : i64, scratch_operands = 2 : i64, tpu.core_type = #tpu.core_type<tc>, window_params = [{transform_indices = @transform_0, window_bounds = array<i64: 1, 4, 32, 128>}, {pipeline_mode = #tpu.pipeline_mode<synchronous>, transform_indices = @transform_1, window_bounds = array<i64: 256, 128>}, {pipeline_mode = #tpu.pipeline_mode<synchronous>, transform_indices = @transform_2, window_bounds = array<i64: 1, 128>}, {transform_indices = @transform_3, window_bounds = array<i64: 1, 64, 32>}]} {
    %c0 = arith.constant 0 : index
    %c0_0 = arith.constant 0 : index
    %c0_1 = arith.constant 0 : index
    %c0_2 = arith.constant 0 : index
    %0 = vector.load %arg2[%c0, %c0_0, %c0_1, %c0_2] : memref<1x4x32x128xf32, #tpu.memory_space<vmem>>, vector<1x4x8x128xf32>
    %1 = vector.shape_cast %0 : vector<1x4x8x128xf32> to vector<4x8x128xf32>
    %2 = vector.shape_cast %1 : vector<4x8x128xf32> to vector<32x128xf32>
    %3 = tpu.transpose %2, [1, 0] : vector<32x128xf32> -> vector<128x32xf32>
    %c0_3 = arith.constant 0 : index
    %c0_4 = arith.constant 0 : index
    %4 = vector.load %arg6[%c0_3, %c0_4] : memref<128x32xf32, #tpu.memory_space<vmem>>, vector<128x32xf32>
    tpu.vector_store %arg6[%c0_3, %c0_4], %3 {strides = array<i32>} : memref<128x32xf32, #tpu.memory_space<vmem>>, vector<128x32xf32>,
    %c0_5 = arith.constant 0 : index
    %c0_6 = arith.constant 0 : index
    %5 = tpu.strided_load %arg6[%c0_5, %c0_6] {strides = array<i32: 8, 1>} : memref<128x32xf32, #tpu.memory_space<vmem>>, vector<16x32xf32>
    %6 = arith.truncf %5 : vector<16x32xf32> to vector<16x32xbf16>
    %c0_7 = arith.constant 0 : index
    %c0_8 = arith.constant 0 : index
    %7 = vector.load %arg7[%c0_7, %c0_8] : memref<64x256xbf16, #tpu.memory_space<vmem>>, vector<16x32xbf16>
    tpu.vector_store %arg7[%c0_7, %c0_8], %6 {strides = array<i32>} : memref<64x256xbf16, #tpu.memory_space<vmem>>, vector<16x32xbf16>,
    %c1 = arith.constant 1 : index
    %c0_9 = arith.constant 0 : index
    %8 = tpu.strided_load %arg6[%c1, %c0_9] {strides = array<i32: 8, 1>} : memref<128x32xf32, #tpu.memory_space<vmem>>, vector<16x32xf32>
    %9 = arith.truncf %8 : vector<16x32xf32> to vector<16x32xbf16>
    %c0_10 = arith.constant 0 : index
    %c32 = arith.constant 32 : index
    %10 = vector.load %arg7[%c0_10, %c32] : memref<64x256xbf16, #tpu.memory_space<vmem>>, vector<16x32xbf16>
    tpu.vector_store %arg7[%c0_10, %c32], %9 {strides = array<i32>} : memref<64x256xbf16, #tpu.memory_space<vmem>>, vector<16x32xbf16>,
    %c2 = arith.constant 2 : index
    %c0_11 = arith.constant 0 : index
    %11 = tpu.strided_load %arg6[%c2, %c0_11] {strides = array<i32: 8, 1>} : memref<128x32xf32, #tpu.memory_space<vmem>>, vector<16x32xf32>
    %12 = arith.truncf %11 : vector<16x32xf32> to vector<16x32xbf16>
    %c0_12 = arith.constant 0 : index
    %c64 = arith.constant 64 : index
    %13 = vector.load %arg7[%c0_12, %c64] : memref<64x256xbf16, #tpu.memory_space<vmem>>, vector<16x32xbf16>
    tpu.vector_store %arg7[%c0_12, %c64], %12 {strides = array<i32>} : memref<64x256xbf16, #tpu.memory_space<vmem>>, vector<16x32xbf16>,
    %c3 = arith.constant 3 : index
    %c0_13 = arith.constant 0 : index
    %14 = tpu.strided_load %arg6[%c3, %c0_13] {strides = array<i32: 8, 1>} : memref<128x32xf32, #tpu.memory_space<vmem>>, vector<16x32xf32>
    %15 = arith.truncf %14 : vector<16x32xf32> to vector<16x32xbf16>
    %c0_14 = arith.constant 0 : index
    %c96 = arith.constant 96 : index
    %16 = vector.load %arg7[%c0_14, %c96] : memref<64x256xbf16, #tpu.memory_space<vmem>>, vector<16x32xbf16>
    tpu.vector_store %arg7[%c0_14, %c96], %15 {strides = array<i32>} : memref<64x256xbf16, #tpu.memory_space<vmem>>, vector<16x32xbf16>,
    %c4 = arith.constant 4 : index
    %c0_15 = arith.constant 0 : index
    %17 = tpu.strided_load %arg6[%c4, %c0_15] {strides = array<i32: 8, 1>} : memref<128x32xf32, #tpu.memory_space<vmem>>, vector<16x32xf32>
    %18 = arith.truncf %17 : vector<16x32xf32> to vector<16x32xbf16>
    %c0_16 = arith.constant 0 : index
    %c128 = arith.constant 128 : index
    %19 = vector.load %arg7[%c0_16, %c128] : memref<64x256xbf16, #tpu.memory_space<vmem>>, vector<16x32xbf16>
    tpu.vector_store %arg7[%c0_16, %c128], %18 {strides = array<i32>} : memref<64x256xbf16, #tpu.memory_space<vmem>>, vector<16x32xbf16>,
    %c5 = arith.constant 5 : index
    %c0_17 = arith.constant 0 : index
    %20 = tpu.strided_load %arg6[%c5, %c0_17] {strides = array<i32: 8, 1>} : memref<128x32xf32, #tpu.memory_space<vmem>>, vector<16x32xf32>
    %21 = arith.truncf %20 : vector<16x32xf32> to vector<16x32xbf16>
    %c0_18 = arith.constant 0 : index
    %c160 = arith.constant 160 : index
    %22 = vector.load %arg7[%c0_18, %c160] : memref<64x256xbf16, #tpu.memory_space<vmem>>, vector<16x32xbf16>
    tpu.vector_store %arg7[%c0_18, %c160], %21 {strides = array<i32>} : memref<64x256xbf16, #tpu.memory_space<vmem>>, vector<16x32xbf16>,
    %c6 = arith.constant 6 : index
    %c0_19 = arith.constant 0 : index
    %23 = tpu.strided_load %arg6[%c6, %c0_19] {strides = array<i32: 8, 1>} : memref<128x32xf32, #tpu.memory_space<vmem>>, vector<16x32xf32>
    %24 = arith.truncf %23 : vector<16x32xf32> to vector<16x32xbf16>
    %c0_20 = arith.constant 0 : index
    %c192 = arith.constant 192 : index
    %25 = vector.load %arg7[%c0_20, %c192] : memref<64x256xbf16, #tpu.memory_space<vmem>>, vector<16x32xbf16>
    tpu.vector_store %arg7[%c0_20, %c192], %24 {strides = array<i32>} : memref<64x256xbf16, #tpu.memory_space<vmem>>, vector<16x32xbf16>,
    %c7 = arith.constant 7 : index
    %c0_21 = arith.constant 0 : index
    %26 = tpu.strided_load %arg6[%c7, %c0_21] {strides = array<i32: 8, 1>} : memref<128x32xf32, #tpu.memory_space<vmem>>, vector<16x32xf32>
    %27 = arith.truncf %26 : vector<16x32xf32> to vector<16x32xbf16>
    %c0_22 = arith.constant 0 : index
    %c224 = arith.constant 224 : index
    %28 = vector.load %arg7[%c0_22, %c224] : memref<64x256xbf16, #tpu.memory_space<vmem>>, vector<16x32xbf16>
    tpu.vector_store %arg7[%c0_22, %c224], %27 {strides = array<i32>} : memref<64x256xbf16, #tpu.memory_space<vmem>>, vector<16x32xbf16>,
    %c0_23 = arith.constant 0 : index
    %c0_24 = arith.constant 0 : index
    %c8 = arith.constant 8 : index
    %c0_25 = arith.constant 0 : index
    %29 = vector.load %arg2[%c0_23, %c0_24, %c8, %c0_25] : memref<1x4x32x128xf32, #tpu.memory_space<vmem>>, vector<1x4x8x128xf32>
    %30 = vector.shape_cast %29 : vector<1x4x8x128xf32> to vector<4x8x128xf32>
    %31 = vector.shape_cast %30 : vector<4x8x128xf32> to vector<32x128xf32>
    %32 = tpu.transpose %31, [1, 0] : vector<32x128xf32> -> vector<128x32xf32>
    %c0_26 = arith.constant 0 : index
    %c0_27 = arith.constant 0 : index
    %33 = vector.load %arg6[%c0_26, %c0_27] : memref<128x32xf32, #tpu.memory_space<vmem>>, vector<128x32xf32>
    tpu.vector_store %arg6[%c0_26, %c0_27], %32 {strides = array<i32>} : memref<128x32xf32, #tpu.memory_space<vmem>>, vector<128x32xf32>,
    %c0_28 = arith.constant 0 : index
    %c0_29 = arith.constant 0 : index
    %34 = tpu.strided_load %arg6[%c0_28, %c0_29] {strides = array<i32: 8, 1>} : memref<128x32xf32, #tpu.memory_space<vmem>>, vector<16x32xf32>
    %35 = arith.truncf %34 : vector<16x32xf32> to vector<16x32xbf16>
    %c16 = arith.constant 16 : index
    %c0_30 = arith.constant 0 : index
    %36 = vector.load %arg7[%c16, %c0_30] : memref<64x256xbf16, #tpu.memory_space<vmem>>, vector<16x32xbf16>
    tpu.vector_store %arg7[%c16, %c0_30], %35 {strides = array<i32>} : memref<64x256xbf16, #tpu.memory_space<vmem>>, vector<16x32xbf16>,
    %c1_31 = arith.constant 1 : index
    %c0_32 = arith.constant 0 : index
    %37 = tpu.strided_load %arg6[%c1_31, %c0_32] {strides = array<i32: 8, 1>} : memref<128x32xf32, #tpu.memory_space<vmem>>, vector<16x32xf32>
    %38 = arith.truncf %37 : vector<16x32xf32> to vector<16x32xbf16>
    %c16_33 = arith.constant 16 : index
    %c32_34 = arith.constant 32 : index
    %39 = vector.load %arg7[%c16_33, %c32_34] : memref<64x256xbf16, #tpu.memory_space<vmem>>, vector<16x32xbf16>
    tpu.vector_store %arg7[%c16_33, %c32_34], %38 {strides = array<i32>} : memref<64x256xbf16, #tpu.memory_space<vmem>>, vector<16x32xbf16>,
    %c2_35 = arith.constant 2 : index
    %c0_36 = arith.constant 0 : index
    %40 = tpu.strided_load %arg6[%c2_35, %c0_36] {strides = array<i32: 8, 1>} : memref<128x32xf32, #tpu.memory_space<vmem>>, vector<16x32xf32>
    %41 = arith.truncf %40 : vector<16x32xf32> to vector<16x32xbf16>
    %c16_37 = arith.constant 16 : index
    %c64_38 = arith.constant 64 : index
    %42 = vector.load %arg7[%c16_37, %c64_38] : memref<64x256xbf16, #tpu.memory_space<vmem>>, vector<16x32xbf16>
    tpu.vector_store %arg7[%c16_37, %c64_38], %41 {strides = array<i32>} : memref<64x256xbf16, #tpu.memory_space<vmem>>, vector<16x32xbf16>,
    %c3_39 = arith.constant 3 : index
    %c0_40 = arith.constant 0 : index
    %43 = tpu.strided_load %arg6[%c3_39, %c0_40] {strides = array<i32: 8, 1>} : memref<128x32xf32, #tpu.memory_space<vmem>>, vector<16x32xf32>
    %44 = arith.truncf %43 : vector<16x32xf32> to vector<16x32xbf16>
    %c16_41 = arith.constant 16 : index
    %c96_42 = arith.constant 96 : index
    %45 = vector.load %arg7[%c16_41, %c96_42] : memref<64x256xbf16, #tpu.memory_space<vmem>>, vector<16x32xbf16>
    tpu.vector_store %arg7[%c16_41, %c96_42], %44 {strides = array<i32>} : memref<64x256xbf16, #tpu.memory_space<vmem>>, vector<16x32xbf16>,
    %c4_43 = arith.constant 4 : index
    %c0_44 = arith.constant 0 : index
    %46 = tpu.strided_load %arg6[%c4_43, %c0_44] {strides = array<i32: 8, 1>} : memref<128x32xf32, #tpu.memory_space<vmem>>, vector<16x32xf32>
    %47 = arith.truncf %46 : vector<16x32xf32> to vector<16x32xbf16>
    %c16_45 = arith.constant 16 : index
    %c128_46 = arith.constant 128 : index
    %48 = vector.load %arg7[%c16_45, %c128_46] : memref<64x256xbf16, #tpu.memory_space<vmem>>, vector<16x32xbf16>
    tpu.vector_store %arg7[%c16_45, %c128_46], %47 {strides = array<i32>} : memref<64x256xbf16, #tpu.memory_space<vmem>>, vector<16x32xbf16>,
    %c5_47 = arith.constant 5 : index
    %c0_48 = arith.constant 0 : index
    %49 = tpu.strided_load %arg6[%c5_47, %c0_48] {strides = array<i32: 8, 1>} : memref<128x32xf32, #tpu.memory_space<vmem>>, vector<16x32xf32>
    %50 = arith.truncf %49 : vector<16x32xf32> to vector<16x32xbf16>
    %c16_49 = arith.constant 16 : index
    %c160_50 = arith.constant 160 : index
    %51 = vector.load %arg7[%c16_49, %c160_50] : memref<64x256xbf16, #tpu.memory_space<vmem>>, vector<16x32xbf16>
    tpu.vector_store %arg7[%c16_49, %c160_50], %50 {strides = array<i32>} : memref<64x256xbf16, #tpu.memory_space<vmem>>, vector<16x32xbf16>,
    %c6_51 = arith.constant 6 : index
    %c0_52 = arith.constant 0 : index
    %52 = tpu.strided_load %arg6[%c6_51, %c0_52] {strides = array<i32: 8, 1>} : memref<128x32xf32, #tpu.memory_space<vmem>>, vector<16x32xf32>
    %53 = arith.truncf %52 : vector<16x32xf32> to vector<16x32xbf16>
    %c16_53 = arith.constant 16 : index
    %c192_54 = arith.constant 192 : index
    %54 = vector.load %arg7[%c16_53, %c192_54] : memref<64x256xbf16, #tpu.memory_space<vmem>>, vector<16x32xbf16>
    tpu.vector_store %arg7[%c16_53, %c192_54], %53 {strides = array<i32>} : memref<64x256xbf16, #tpu.memory_space<vmem>>, vector<16x32xbf16>,
    %c7_55 = arith.constant 7 : index
    %c0_56 = arith.constant 0 : index
    %55 = tpu.strided_load %arg6[%c7_55, %c0_56] {strides = array<i32: 8, 1>} : memref<128x32xf32, #tpu.memory_space<vmem>>, vector<16x32xf32>
    %56 = arith.truncf %55 : vector<16x32xf32> to vector<16x32xbf16>
    %c16_57 = arith.constant 16 : index
    %c224_58 = arith.constant 224 : index
    %57 = vector.load %arg7[%c16_57, %c224_58] : memref<64x256xbf16, #tpu.memory_space<vmem>>, vector<16x32xbf16>
    tpu.vector_store %arg7[%c16_57, %c224_58], %56 {strides = array<i32>} : memref<64x256xbf16, #tpu.memory_space<vmem>>, vector<16x32xbf16>,
    %c0_59 = arith.constant 0 : index
    %c0_60 = arith.constant 0 : index
    %c16_61 = arith.constant 16 : index
    %c0_62 = arith.constant 0 : index
    %58 = vector.load %arg2[%c0_59, %c0_60, %c16_61, %c0_62] : memref<1x4x32x128xf32, #tpu.memory_space<vmem>>, vector<1x4x8x128xf32>
    %59 = vector.shape_cast %58 : vector<1x4x8x128xf32> to vector<4x8x128xf32>
    %60 = vector.shape_cast %59 : vector<4x8x128xf32> to vector<32x128xf32>
    %61 = tpu.transpose %60, [1, 0] : vector<32x128xf32> -> vector<128x32xf32>
    %c0_63 = arith.constant 0 : index
    %c0_64 = arith.constant 0 : index
    %62 = vector.load %arg6[%c0_63, %c0_64] : memref<128x32xf32, #tpu.memory_space<vmem>>, vector<128x32xf32>
    tpu.vector_store %arg6[%c0_63, %c0_64], %61 {strides = array<i32>} : memref<128x32xf32, #tpu.memory_space<vmem>>, vector<128x32xf32>,
    %c0_65 = arith.constant 0 : index
    %c0_66 = arith.constant 0 : index
    %63 = tpu.strided_load %arg6[%c0_65, %c0_66] {strides = array<i32: 8, 1>} : memref<128x32xf32, #tpu.memory_space<vmem>>, vector<16x32xf32>
    %64 = arith.truncf %63 : vector<16x32xf32> to vector<16x32xbf16>
    %c32_67 = arith.constant 32 : index
    %c0_68 = arith.constant 0 : index
    %65 = vector.load %arg7[%c32_67, %c0_68] : memref<64x256xbf16, #tpu.memory_space<vmem>>, vector<16x32xbf16>
    tpu.vector_store %arg7[%c32_67, %c0_68], %64 {strides = array<i32>} : memref<64x256xbf16, #tpu.memory_space<vmem>>, vector<16x32xbf16>,
    %c1_69 = arith.constant 1 : index
    %c0_70 = arith.constant 0 : index
    %66 = tpu.strided_load %arg6[%c1_69, %c0_70] {strides = array<i32: 8, 1>} : memref<128x32xf32, #tpu.memory_space<vmem>>, vector<16x32xf32>
    %67 = arith.truncf %66 : vector<16x32xf32> to vector<16x32xbf16>
    %c32_71 = arith.constant 32 : index
    %c32_72 = arith.constant 32 : index
    %68 = vector.load %arg7[%c32_71, %c32_72] : memref<64x256xbf16, #tpu.memory_space<vmem>>, vector<16x32xbf16>
    tpu.vector_store %arg7[%c32_71, %c32_72], %67 {strides = array<i32>} : memref<64x256xbf16, #tpu.memory_space<vmem>>, vector<16x32xbf16>,
    %c2_73 = arith.constant 2 : index
    %c0_74 = arith.constant 0 : index
    %69 = tpu.strided_load %arg6[%c2_73, %c0_74] {strides = array<i32: 8, 1>} : memref<128x32xf32, #tpu.memory_space<vmem>>, vector<16x32xf32>
    %70 = arith.truncf %69 : vector<16x32xf32> to vector<16x32xbf16>
    %c32_75 = arith.constant 32 : index
    %c64_76 = arith.constant 64 : index
    %71 = vector.load %arg7[%c32_75, %c64_76] : memref<64x256xbf16, #tpu.memory_space<vmem>>, vector<16x32xbf16>
    tpu.vector_store %arg7[%c32_75, %c64_76], %70 {strides = array<i32>} : memref<64x256xbf16, #tpu.memory_space<vmem>>, vector<16x32xbf16>,
    %c3_77 = arith.constant 3 : index
    %c0_78 = arith.constant 0 : index
    %72 = tpu.strided_load %arg6[%c3_77, %c0_78] {strides = array<i32: 8, 1>} : memref<128x32xf32, #tpu.memory_space<vmem>>, vector<16x32xf32>
    %73 = arith.truncf %72 : vector<16x32xf32> to vector<16x32xbf16>
    %c32_79 = arith.constant 32 : index
    %c96_80 = arith.constant 96 : index
    %74 = vector.load %arg7[%c32_79, %c96_80] : memref<64x256xbf16, #tpu.memory_space<vmem>>, vector<16x32xbf16>
    tpu.vector_store %arg7[%c32_79, %c96_80], %73 {strides = array<i32>} : memref<64x256xbf16, #tpu.memory_space<vmem>>, vector<16x32xbf16>,
    %c4_81 = arith.constant 4 : index
    %c0_82 = arith.constant 0 : index
    %75 = tpu.strided_load %arg6[%c4_81, %c0_82] {strides = array<i32: 8, 1>} : memref<128x32xf32, #tpu.memory_space<vmem>>, vector<16x32xf32>
    %76 = arith.truncf %75 : vector<16x32xf32> to vector<16x32xbf16>
    %c32_83 = arith.constant 32 : index
    %c128_84 = arith.constant 128 : index
    %77 = vector.load %arg7[%c32_83, %c128_84] : memref<64x256xbf16, #tpu.memory_space<vmem>>, vector<16x32xbf16>
    tpu.vector_store %arg7[%c32_83, %c128_84], %76 {strides = array<i32>} : memref<64x256xbf16, #tpu.memory_space<vmem>>, vector<16x32xbf16>,
    %c5_85 = arith.constant 5 : index
    %c0_86 = arith.constant 0 : index
    %78 = tpu.strided_load %arg6[%c5_85, %c0_86] {strides = array<i32: 8, 1>} : memref<128x32xf32, #tpu.memory_space<vmem>>, vector<16x32xf32>
    %79 = arith.truncf %78 : vector<16x32xf32> to vector<16x32xbf16>
    %c32_87 = arith.constant 32 : index
    %c160_88 = arith.constant 160 : index
    %80 = vector.load %arg7[%c32_87, %c160_88] : memref<64x256xbf16, #tpu.memory_space<vmem>>, vector<16x32xbf16>
    tpu.vector_store %arg7[%c32_87, %c160_88], %79 {strides = array<i32>} : memref<64x256xbf16, #tpu.memory_space<vmem>>, vector<16x32xbf16>,
    %c6_89 = arith.constant 6 : index
    %c0_90 = arith.constant 0 : index
    %81 = tpu.strided_load %arg6[%c6_89, %c0_90] {strides = array<i32: 8, 1>} : memref<128x32xf32, #tpu.memory_space<vmem>>, vector<16x32xf32>
    %82 = arith.truncf %81 : vector<16x32xf32> to vector<16x32xbf16>
    %c32_91 = arith.constant 32 : index
    %c192_92 = arith.constant 192 : index
    %83 = vector.load %arg7[%c32_91, %c192_92] : memref<64x256xbf16, #tpu.memory_space<vmem>>, vector<16x32xbf16>
    tpu.vector_store %arg7[%c32_91, %c192_92], %82 {strides = array<i32>} : memref<64x256xbf16, #tpu.memory_space<vmem>>, vector<16x32xbf16>,
    %c7_93 = arith.constant 7 : index
    %c0_94 = arith.constant 0 : index
    %84 = tpu.strided_load %arg6[%c7_93, %c0_94] {strides = array<i32: 8, 1>} : memref<128x32xf32, #tpu.memory_space<vmem>>, vector<16x32xf32>
    %85 = arith.truncf %84 : vector<16x32xf32> to vector<16x32xbf16>
    %c32_95 = arith.constant 32 : index
    %c224_96 = arith.constant 224 : index
    %86 = vector.load %arg7[%c32_95, %c224_96] : memref<64x256xbf16, #tpu.memory_space<vmem>>, vector<16x32xbf16>
    tpu.vector_store %arg7[%c32_95, %c224_96], %85 {strides = array<i32>} : memref<64x256xbf16, #tpu.memory_space<vmem>>, vector<16x32xbf16>,
    %c0_97 = arith.constant 0 : index
    %c0_98 = arith.constant 0 : index
    %c24 = arith.constant 24 : index
    %c0_99 = arith.constant 0 : index
    %87 = vector.load %arg2[%c0_97, %c0_98, %c24, %c0_99] : memref<1x4x32x128xf32, #tpu.memory_space<vmem>>, vector<1x4x8x128xf32>
    %88 = vector.shape_cast %87 : vector<1x4x8x128xf32> to vector<4x8x128xf32>
    %89 = vector.shape_cast %88 : vector<4x8x128xf32> to vector<32x128xf32>
    %90 = tpu.transpose %89, [1, 0] : vector<32x128xf32> -> vector<128x32xf32>
    %c0_100 = arith.constant 0 : index
    %c0_101 = arith.constant 0 : index
    %91 = vector.load %arg6[%c0_100, %c0_101] : memref<128x32xf32, #tpu.memory_space<vmem>>, vector<128x32xf32>
    tpu.vector_store %arg6[%c0_100, %c0_101], %90 {strides = array<i32>} : memref<128x32xf32, #tpu.memory_space<vmem>>, vector<128x32xf32>,
    %c0_102 = arith.constant 0 : index
    %c0_103 = arith.constant 0 : index
    %92 = tpu.strided_load %arg6[%c0_102, %c0_103] {strides = array<i32: 8, 1>} : memref<128x32xf32, #tpu.memory_space<vmem>>, vector<16x32xf32>
    %93 = arith.truncf %92 : vector<16x32xf32> to vector<16x32xbf16>
    %c48 = arith.constant 48 : index
    %c0_104 = arith.constant 0 : index
    %94 = vector.load %arg7[%c48, %c0_104] : memref<64x256xbf16, #tpu.memory_space<vmem>>, vector<16x32xbf16>
    tpu.vector_store %arg7[%c48, %c0_104], %93 {strides = array<i32>} : memref<64x256xbf16, #tpu.memory_space<vmem>>, vector<16x32xbf16>,
    %c1_105 = arith.constant 1 : index
    %c0_106 = arith.constant 0 : index
    %95 = tpu.strided_load %arg6[%c1_105, %c0_106] {strides = array<i32: 8, 1>} : memref<128x32xf32, #tpu.memory_space<vmem>>, vector<16x32xf32>
    %96 = arith.truncf %95 : vector<16x32xf32> to vector<16x32xbf16>
    %c48_107 = arith.constant 48 : index
    %c32_108 = arith.constant 32 : index
    %97 = vector.load %arg7[%c48_107, %c32_108] : memref<64x256xbf16, #tpu.memory_space<vmem>>, vector<16x32xbf16>
    tpu.vector_store %arg7[%c48_107, %c32_108], %96 {strides = array<i32>} : memref<64x256xbf16, #tpu.memory_space<vmem>>, vector<16x32xbf16>,
    %c2_109 = arith.constant 2 : index
    %c0_110 = arith.constant 0 : index
    %98 = tpu.strided_load %arg6[%c2_109, %c0_110] {strides = array<i32: 8, 1>} : memref<128x32xf32, #tpu.memory_space<vmem>>, vector<16x32xf32>
    %99 = arith.truncf %98 : vector<16x32xf32> to vector<16x32xbf16>
    %c48_111 = arith.constant 48 : index
    %c64_112 = arith.constant 64 : index
    %100 = vector.load %arg7[%c48_111, %c64_112] : memref<64x256xbf16, #tpu.memory_space<vmem>>, vector<16x32xbf16>
    tpu.vector_store %arg7[%c48_111, %c64_112], %99 {strides = array<i32>} : memref<64x256xbf16, #tpu.memory_space<vmem>>, vector<16x32xbf16>,
    %c3_113 = arith.constant 3 : index
    %c0_114 = arith.constant 0 : index
    %101 = tpu.strided_load %arg6[%c3_113, %c0_114] {strides = array<i32: 8, 1>} : memref<128x32xf32, #tpu.memory_space<vmem>>, vector<16x32xf32>
    %102 = arith.truncf %101 : vector<16x32xf32> to vector<16x32xbf16>
    %c48_115 = arith.constant 48 : index
    %c96_116 = arith.constant 96 : index
    %103 = vector.load %arg7[%c48_115, %c96_116] : memref<64x256xbf16, #tpu.memory_space<vmem>>, vector<16x32xbf16>
    tpu.vector_store %arg7[%c48_115, %c96_116], %102 {strides = array<i32>} : memref<64x256xbf16, #tpu.memory_space<vmem>>, vector<16x32xbf16>,
    %c4_117 = arith.constant 4 : index
    %c0_118 = arith.constant 0 : index
    %104 = tpu.strided_load %arg6[%c4_117, %c0_118] {strides = array<i32: 8, 1>} : memref<128x32xf32, #tpu.memory_space<vmem>>, vector<16x32xf32>
    %105 = arith.truncf %104 : vector<16x32xf32> to vector<16x32xbf16>
    %c48_119 = arith.constant 48 : index
    %c128_120 = arith.constant 128 : index
    %106 = vector.load %arg7[%c48_119, %c128_120] : memref<64x256xbf16, #tpu.memory_space<vmem>>, vector<16x32xbf16>
    tpu.vector_store %arg7[%c48_119, %c128_120], %105 {strides = array<i32>} : memref<64x256xbf16, #tpu.memory_space<vmem>>, vector<16x32xbf16>,
    %c5_121 = arith.constant 5 : index
    %c0_122 = arith.constant 0 : index
    %107 = tpu.strided_load %arg6[%c5_121, %c0_122] {strides = array<i32: 8, 1>} : memref<128x32xf32, #tpu.memory_space<vmem>>, vector<16x32xf32>
    %108 = arith.truncf %107 : vector<16x32xf32> to vector<16x32xbf16>
    %c48_123 = arith.constant 48 : index
    %c160_124 = arith.constant 160 : index
    %109 = vector.load %arg7[%c48_123, %c160_124] : memref<64x256xbf16, #tpu.memory_space<vmem>>, vector<16x32xbf16>
    tpu.vector_store %arg7[%c48_123, %c160_124], %108 {strides = array<i32>} : memref<64x256xbf16, #tpu.memory_space<vmem>>, vector<16x32xbf16>,
    %c6_125 = arith.constant 6 : index
    %c0_126 = arith.constant 0 : index
    %110 = tpu.strided_load %arg6[%c6_125, %c0_126] {strides = array<i32: 8, 1>} : memref<128x32xf32, #tpu.memory_space<vmem>>, vector<16x32xf32>
    %111 = arith.truncf %110 : vector<16x32xf32> to vector<16x32xbf16>
    %c48_127 = arith.constant 48 : index
    %c192_128 = arith.constant 192 : index
    %112 = vector.load %arg7[%c48_127, %c192_128] : memref<64x256xbf16, #tpu.memory_space<vmem>>, vector<16x32xbf16>
    tpu.vector_store %arg7[%c48_127, %c192_128], %111 {strides = array<i32>} : memref<64x256xbf16, #tpu.memory_space<vmem>>, vector<16x32xbf16>,
    %c7_129 = arith.constant 7 : index
    %c0_130 = arith.constant 0 : index
    %113 = tpu.strided_load %arg6[%c7_129, %c0_130] {strides = array<i32: 8, 1>} : memref<128x32xf32, #tpu.memory_space<vmem>>, vector<16x32xf32>
    %114 = arith.truncf %113 : vector<16x32xf32> to vector<16x32xbf16>
    %c48_131 = arith.constant 48 : index
    %c224_132 = arith.constant 224 : index
    %115 = vector.load %arg7[%c48_131, %c224_132] : memref<64x256xbf16, #tpu.memory_space<vmem>>, vector<16x32xbf16>
    tpu.vector_store %arg7[%c48_131, %c224_132], %114 {strides = array<i32>} : memref<64x256xbf16, #tpu.memory_space<vmem>>, vector<16x32xbf16>,
    %c0_133 = arith.constant 0 : index
    %c0_134 = arith.constant 0 : index
    %116 = vector.load %arg7[%c0_133, %c0_134] : memref<64x256xbf16, #tpu.memory_space<vmem>>, vector<64x256xbf16>
    %c0_135 = arith.constant 0 : index
    %c0_136 = arith.constant 0 : index
    %117 = vector.load %arg3[%c0_135, %c0_136] : memref<256x128xbf16, #tpu.memory_space<vmem>>, vector<256x128xbf16>
    %cst = arith.constant dense<0.000000e+00> : vector<64x128xf32>
    %118 = tpu.matmul %116, %117, %cst {dimension_numbers = #tpu.dot_dimension_numbers<[1], [0], [0], [1], [0, 0, 1, 1], [], []>} : vector<64x256xbf16>, vector<256x128xbf16>, vector<64x128xf32> -> vector<64x128xf32>
    %c0_137 = arith.constant 0 : index
    %c0_138 = arith.constant 0 : index
    %119 = vector.load %arg4[%c0_137, %c0_138] : memref<1x128xf32, #tpu.memory_space<vmem>>, vector<1x128xf32>
    %120 = vector.broadcast %119 : vector<1x128xf32> to vector<64x128xf32>
    %121 = arith.addf %118, %120 : vector<64x128xf32>
    %122 = vector.extract_strided_slice %121 {offsets = [0, 0], sizes = [64, 32], strides = [1, 1]} : vector<64x128xf32> to vector<64x32xf32>
    %123 = arith.truncf %122 : vector<64x32xf32> to vector<64x32xbf16>
    %c0_139 = arith.constant 0 : index
    %c0_140 = arith.constant 0 : index
    %c0_141 = arith.constant 0 : index
    %124 = vector.load %arg5[%c0_139, %c0_140, %c0_141] : memref<1x64x32xbf16, #tpu.memory_space<vmem>>, vector<1x64x32xbf16>
    %125 = vector.shape_cast %124 : vector<1x64x32xbf16> to vector<64x32xbf16>
    %126 = vector.shape_cast %123 : vector<64x32xbf16> to vector<1x64x32xbf16>
    tpu.vector_store %arg5[%c0_139, %c0_140, %c0_141], %126 {strides = array<i32>} : memref<1x64x32xbf16, #tpu.memory_space<vmem>>, vector<1x64x32xbf16>,
    return
  }
  func.func @transform_0(%arg0: i32, %arg1: i32) -> (i32, i32, i32, i32) {
    %c0_i32 = arith.constant 0 : i32
    %c0_i32_0 = arith.constant 0 : i32
    %c0_i32_1 = arith.constant 0 : i32
    return %arg0, %c0_i32, %arg1, %c0_i32_0 : i32, i32, i32, i32
  }
  func.func @transform_1(%arg0: i32, %arg1: i32) -> (i32, i32) {
    %c0_i32 = arith.constant 0 : i32
    %c0_i32_0 = arith.constant 0 : i32
    %c0_i32_1 = arith.constant 0 : i32
    return %c0_i32, %c0_i32_0 : i32, i32
  }
  func.func @transform_2(%arg0: i32, %arg1: i32) -> (i32, i32) {
    %c0_i32 = arith.constant 0 : i32
    %c0_i32_0 = arith.constant 0 : i32
    %c0_i32_1 = arith.constant 0 : i32
    return %c0_i32, %c0_i32_0 : i32, i32
  }
  func.func @transform_3(%arg0: i32, %arg1: i32) -> (i32, i32, i32) {
    %c0_i32 = arith.constant 0 : i32
    %c0_i32_0 = arith.constant 0 : i32
    return %arg0, %arg1, %c0_i32 : i32, i32, i32
  }
}

</mosaic_0001>

<bundles_post_ra>
// kernel: patch_embed_prepared.1
= control target key start
LH: loop header
LB: loop body
LE: loop exit
PB: predicated region body
PF: predicated region fallthrough
CT: control target
= control target key end

     0   :  { %s2104_s0 = inlined_call_operand.hbm [shape: f32[2,4,128,128], index: 0, kind: input, shape index: {}]   ;;  %s2105_s1 = inlined_call_operand.hbm [shape: bf16[256,128], index: 1, kind: input, shape index: {}]   ;;  %s2106_s2 = inlined_call_operand.vmem [shape: f32[1,128], index: 2, kind: input, shape index: {}]   ;;  %s2107_s3 = inlined_call_operand.vmem [shape: bf16[2,256,32], index: 3, kind: output, shape index: {}]  }
   0x1   :  { %2114 = sst [smem:[#allocation15_spill]] %s2105_s1 }
   0x2   :  { %8 = vsyncpa [#allocation5], 0 }
   0x3   :  { %10 = vsyncpa [#allocation5 + $0x1], 0 }
   0x4   :  { %11 = vsyncpa [#allocation7], 0  ;;  %s1548_s12 = smov 0   ;;  %s1550_s13 = smov 0  }
   0x5   :  { %s1552_s14 = smov 0   ;;  %s1554_s15 = smov 0  }
   0x6   :  { %s1556_s16 = smov 0   ;;  %s1558_s17 = smov 0  }
   0x7   :  { %s1560_s18 = smov 0   ;;  %s1562_s19 = smov 0  }
   0x8 LB: > { %s1196_s20 = sadd.s32 4294967295, %s1514_s19   ;;  %s26_s21 = sadd.s32 1, %s1506_s17  ;;  %s1514_s19 = sphi %s1562_s19, %s17_s19   ;;  %s1510_s18 = sphi %s1560_s18, %s2140_s18   ;;  %s1506_s17 = sphi %s1558_s17, %s2139_s17   ;;  %s1502_s16 = sphi %s1556_s16, %s2138_s16   ;;  %s1498_s15 = sphi %s1554_s15, %s2137_s15   ;;  %s1494_s14 = sphi %s1552_s14, %s2136_s14   ;;  %s1490_s13 = sphi %s1550_s13, %s2135_s13   ;;  %s1486_s12 = sphi %s1548_s12, %s2134_s12  }
   0x9   : > { %p27_p0 = scmp.ge.s32.totalorder %s26_s21, 4  ;;  %s29_s22 = sadd.s32 1, %s1510_s18 }
   0xa   : > { %s38_s23 = sadd.s32 1, %s1494_s14  ;;  %p45_p1 = scmp.ne.s32.totalorder %s1494_s14, %s1490_s13 }
   0xb   : > { %s2142_s21 = smov (%p27_p0, %s26_s21), 0  ;;  %s2144_s22 = smov (!%p27_p0, %s29_s22), %s1510_s18 }
   0xc   : > { %s34_s24 = ssub.s32 %s1506_s17, %s2142_s21  ;;  %p46_p2 = scmp.eq.s32.totalorder %s1514_s19, 0 }
   0xd   : > { %p31_p3 = scmp.ge.s32.totalorder %s2144_s22, 2  ;;  %p51_p4 = scmp.ne.s32.totalorder %s1490_s13, %s1486_s12 }
   0xe   : > { %p1599_p5 = por %p46_p2, %p45_p1  ;;  %p1603_p6 = scmp.eq.s32.totalorder %s1196_s20, 0 }
   0xf   : > { %s2146_s22 = smov (%p31_p3, %s2144_s22), 0  ;;  %p1198_p8 = scmp.ge.s32.totalorder %s1514_s19, 1 }
  0x10   : > { %s2115_s25 = scalar_select %p1599_p5, 1, 0 }
  0x11   : > { %s2116_s26 = scalar_select %p1603_p6, 1, 0 }
  0x12   : > { %p1611_p7 = por %p1603_p6, %p51_p4  ;;  %s33_s28 = ssub.s32 %s1510_s18, %s2146_s22 }
  0x13   : > { %p132_p9 = scmp.lt.s32.totalorder %s1514_s19, 9  ;;  %s35_s29 = sor.u32 %s34_s24, %s33_s28 }
  0x14   : > { %s2117_s27 = scalar_select %p1611_p7, 1, 0 }
  0x15   : > { %p36_p10 = scmp.eq.s32.totalorder %s35_s29, 0  ;;  %p1619_p11 = pnand %p1198_p8, %p132_p9 }
  0x16   : > { %s1516_s5 = smov [#allocation6]   ;;  %s2120_s1 = sld [smem:[#allocation15_spill]] }
  0x17   : > { %s2118_s30 = scalar_select %p1619_p11, 1, 0 }
  0x18   : > { %s1624_s4 = scalar_select %p36_p10, %s1494_s14, %s38_s23  }
  0x19   : > { %p1317_p12 = pneg %p1619_p11  ;;  %s144_s6 = sshll.u32 %s1516_s5, 4  ;;  %s145_s6 = int_to_ptr.vmem [resolvable:$true] %s144_s6 }
  0x1b   : > { %p1630_p13 = pnand %p1317_p12, %p1603_p6 }
  0x1c   : > { %s1416_s10 = scalar_lea.hbm %s2120_s1, 2048 }
  0x1d   : > { %p1417_p0 = scmp.ne.s32.totalorder %s2120_s1, %s1416_s10  ;;  %p1418_p1 = pneg %p1630_p13 }
  0x1e   : > { %p1423_p4 = scmp.lt.u32.totalorder %s1416_s10, %s2120_s1 }
  0x1f   : > { %p1419_p2 = pnand %p1418_p1, %p1417_p0 }
  0x21   : > { %p1420_p3 = pneg %p1419_p2 }
  0x23   : > { %p1425_p8 = pnand %p1423_p4, %p1420_p3 }
  0x25   : > { %1428 = shalt.err (!%p1425_p8)
}
  0x26   : > { %s1429_s24 = scalar_lea.vmem %s145_s6, 2048  ;;  %p1437_p6 = scmp.lt.s32.totalorder %s145_s6, %s145_s6 }
  0x27   : > { %p1430_p9 = scmp.ne.s32.totalorder %s145_s6, %s1429_s24  ;;  %p1438_p7 = scmp.lt.s32.totalorder %s1429_s24, %s1429_s24 }
  0x29   : > { %p1432_p10 = pnand %p1430_p9, %p1418_p1  ;;  %p1439_p11 = por %p1438_p7, %p1437_p6 }
  0x2b   : > { %p1433_p12 = pneg %p1432_p10 }
  0x2d   : > { %p1440_p5 = pnand %p1439_p11, %p1433_p12 }
  0x2f   : > { %1443 = shalt.err (!%p1440_p5)
}
  0x30   : > { %s1517_s28 = smov 64   ;;  %s1518_s29 = smov 4  }
  0x31   : > { %1320 = dma.hbm_to_vmem [thread:$0]  (!%p1630_p13), %s2120_s1, 2048, %s145_s6, [#allocation7], %s1517_s28, %s1517_s28, %s1518_s29  }
  0x32   : > { %p1200_p0 = scmp.ge.s32.totalorder %s1514_s19, 8 }
  0x34   : > { %157 = sbr.rel (%p1200_p0) target bundleno = 76 (0x4c), region = 24 }
  0x3b   : > { %s161_s9 = sand.u32 1, %s1494_s14   ;;  %s1202_s10 = sshll.u32 %s1506_s17, 2 }
  0x3c   : > { %s1201_s11 = sshll.u32 %s161_s9, 7  ;;  %s1203_s12 = sshll.u32 %s1510_s18, 6 }
  0x3d   : > { %s171_s7 = sadd.s32 %s1203_s12, %s1202_s10  ;;  %s165_s20 = scalar_lea.vmem [#allocation4], %s1201_s11 }
  0x3e   : > { %s186_s23 = sshll.u32 %s165_s20, 4  ;;  %s1204_s6 = sshll.u32 %s171_s7, 7  ;;  %s187_s23 = int_to_ptr.vmem [resolvable:$true] %s186_s23 }
  0x3f   : > { %p2121_p5 = scmp.ne.s32.totalorder %s2115_s25, 0  ;;  %s1519_s28 = smov 2048  }
  0x40   : > { %s1520_s5 = smov 512   ;;  %s1521_s8 = smov 4  }
  0x41   : > { %s1306_s24 = scalar_select %p2121_p5, [#allocation0], [#allocation10] }
  0x42   : > { %1307 = sst [smem:[#allocation9]] (%p2121_p5), %s1519_s28  ;;  %s1522_s10 = smov 128  }
  0x43   : > { %s178_s29 = sld [smem:[%s1306_s24]]   ;;  %s173_s7 = scalar_lea.hbm %s2104_s0, %s1204_s6 }
  0x44   : > { %1308 = sst [smem:[#allocation9 + $0x1]] (%p2121_p5), %s1520_s5  ;;  %s1523_s20 = smov 8  }
  0x45   : > { %1309 = sst [smem:[#allocation9 + $0x2]] (%p2121_p5), %s1521_s8  ;;  %s162_s1 = scalar_lea.sflag [#allocation5], %s161_s9 }
  0x46   : > { %1310 = sst [smem:[#allocation9 + $0x3]] (%p2121_p5), %s1522_s10  ;;  %s1524_s5 = smov [#allocation8]  }
  0x47   : > { %1311 = sst [smem:[#allocation9 + $0x4]] (%p2121_p5), %s1522_s10 }
  0x48   : > { %1312 = sst [smem:[#allocation9 + $0x5]] (%p2121_p5), %s1523_s20 }
  0x49   : > { %s1205_s24 = sshll.u32 %s178_s29, 26 }
  0x4a   : > { %s1206_s28 = sadd.s32 134217728, %s1205_s24 }
  0x4b   : > { %1313 = dma.general (%p2121_p5), %s173_s7, 2048, %s187_s23, %s162_s1, %s1524_s5, [#allocation9], %s1206_s28, 0  }
  0x4c PF: > { %p2122_p6 = scmp.ne.s32.totalorder %s2118_s30, 0 }
  0x4e   : > { %211 = sbr.rel (%p2122_p6) target bundleno = 736 (0x2e0), region = 32 }
  0x55   : > { %s213_s8 = sand.u32 1, %s1490_s13   ;;  %p2123_p7 = scmp.ne.s32.totalorder %s2117_s27, 0 }
  0x56   : > { %s1208_s11 = sshll.u32 %s213_s8, 7  ;;  %s214_s6 = scalar_lea.sflag [#allocation5], %s213_s8 }
  0x57   : > { %s1676_s12 = scalar_lea.vmem [#allocation4], %s1208_s11 }
  0x58   : > { %1477 = dma.done.wait (%p2123_p7), %s214_s6, 2048  }
  0x59   : > { %1479 = vsyncadd (%p2123_p7), %s214_s6, 4294965248  ;;  %p2124_p11 = scmp.ne.s32.totalorder %s2116_s26, 0 }
  0x5b   : > { %1481 = dma.done.wait (%p2124_p11), [#allocation7], 2048  }
  0x5c   : > { %1483 = vsyncadd (%p2124_p11), [#allocation7], 4294965248  ;;  %v260_v0 = vld [vmem:[%s1676_s12] sm:$0xff]  ;;  %v419_v1 = vld [vmem:[%s1676_s12 + $0x8] sm:$0xff]  ;;  %vm296_vm0 = vcmask 261120   ;;  %s1525_s1 = smov 32  }
  0x5d   : > { %264 = vxpose.xlu0.b32.start [1/4] (short) %v260_v0, 128  ;;  %423 = vxpose.xlu1.b32.start [1/4] (short) %v419_v1, 128  ;;  %v261_v2 = vld [vmem:[%s1676_s12 + $0x20] sm:$0xff]  ;;  %v420_v3 = vld [vmem:[%s1676_s12 + $0x28] sm:$0xff]  ;;  %v559_v8 = vld [vmem:[%s1676_s12 + $0x10] sm:$0xff]  ;;  %s1526_s25 = smov 64   ;;  %s1527_s26 = smov 96   ;;  %vm335_vm1 = vcmask 523520  }
  0x5e   : > { %v262_v4 = vld [vmem:[%s1676_s12 + $0x40] sm:$0xff]  ;;  %v421_v5 = vld [vmem:[%s1676_s12 + $0x48] sm:$0xff]  ;;  %v699_v9 = vld [vmem:[%s1676_s12 + $0x18] sm:$0xff]  ;;  %vm350_vm2 = vcmask 785920   ;;  %vm365_vm3 = vcmask 1048320   ;;  %s1210_s27 = sshll.u32 %s1498_s15, 3 }
  0x5f   : > { %v263_v6 = vld [vmem:[%s1676_s12 + $0x60] sm:$0xff]  ;;  %v422_v7 = vld [vmem:[%s1676_s12 + $0x68] sm:$0xff]  ;;  %v560_v10 = vld [vmem:[%s1676_s12 + $0x30] sm:$0xff]  ;;  %p250_p13 = scmp.lt.s32.totalorder %s1502_s16, 1  ;;  %p252_p1 = scmp.lt.s32.totalorder %s1210_s27, 31  ;;  %vm1079_vm4 = vcmask 257024  }
  0x60   : > { %v700_v11 = vld [vmem:[%s1676_s12 + $0x38] sm:$0xff]  ;;  %v561_v12 = vld [vmem:[%s1676_s12 + $0x50] sm:$0xff]  ;;  %v1400_v54 = vld [vmem:[#allocation6 + $0x40] sm:$0xff]  }
  0x61   : > { %265 = vxpose.xlu0.b32.cont [2/4] (short) %v261_v2, 128  ;;  %424 = vxpose.xlu1.b32.cont [2/4] (short) %v420_v3, 128  ;;  %v701_v13 = vld [vmem:[%s1676_s12 + $0x58] sm:$0xff]  ;;  %v562_v14 = vld [vmem:[%s1676_s12 + $0x70] sm:$0xff]  ;;  %v1401_v55 = vld [vmem:[#allocation6] sm:$0xff]   ;;  %s2148_s16 = smov (!%p250_p13, %s1502_s16), 1  ;;  %s2150_s27 = smov (!%p252_p1, %s1210_s27), 31 }
  0x62   : > { %v702_v15 = vld [vmem:[%s1676_s12 + $0x78] sm:$0xff]  ;;  %v1402_v56 = vld [vmem:[#allocation6 + $0x48] sm:$0xff]   ;;  %1248 = vmatprep.subr.bf16.mxu0 %v1400_v54  ;;  %1288 = vmatprep.subr.bf16.mxu1 %v1400_v54  ;;  %v1404_v63 = vld [vmem:[#allocation6 + $0x50] sm:$0xff]   ;;  %s1211_s30 = sshll.u32 %s2148_s16, 5 }
  0x63   : > { %1249 = vmatpush3.bf16.msra.mxu0 %v1401_v55  ;;  %v1403_v60 = vld [vmem:[#allocation6 + $0x8] sm:$0xff]   ;;  %1296 = vmatpush3.bf16.msra.mxu1 %v1401_v55  ;;  %v1409_v55 = vld [vmem:[#allocation6 + $0x20] sm:$0xff]   ;;  %s255_s9 = sadd.s32 %s1211_s30, %s2150_s27 }
  0x64   : > { %1250 = vmatprep.subr.bf16.mxu0 %v1402_v56  ;;  %1289 = vmatprep.subr.bf16.mxu1 %v1402_v56  ;;  %s1212_s10 = sshll.u32 %s255_s9, 2 }
  0x65   : > { %266 = vxpose.xlu0.b32.cont [3/4] (short) %v262_v4, 128  ;;  %425 = vxpose.xlu1.b32.cont [3/4] (short) %v421_v5, 128  ;;  %s2062_s20 = scalar_lea.vmem %s2107_s3, %s1212_s10 }
  0x67   : > { %1251 = vmatpush3.bf16.msra.mxu0 %v1403_v60  ;;  %1297 = vmatpush3.bf16.msra.mxu1 %v1403_v60 }
  0x68   : > { %1252 = vmatprep.subr.bf16.mxu0 %v1404_v63  ;;  %1290 = vmatprep.subr.bf16.mxu1 %v1404_v63 }
  0x69   : > { %267 = vxpose.xlu0.b32.end [4/4] (short) %v263_v6, 128  ;;  %426 = vxpose.xlu1.b32.end [4/4] (short) %v422_v7, 128 }
  0x9a   : > { %563 = vxpose.xlu0.b32.start [1/4] (short) %v559_v8, 128  ;;  %703 = vxpose.xlu1.b32.start [1/4] (short) %v699_v9, 128 }
  0x9e   : > { %564 = vxpose.xlu0.b32.cont [2/4] (short) %v560_v10, 128  ;;  %704 = vxpose.xlu1.b32.cont [2/4] (short) %v700_v11, 128 }
  0xa2   : > { %565 = vxpose.xlu0.b32.cont [3/4] (short) %v561_v12, 128  ;;  %705 = vxpose.xlu1.b32.cont [3/4] (short) %v701_v13, 128  ;;  %v1405_v12 = vld [vmem:[#allocation6 + $0x10] sm:$0xff]  }
  0xa3   : > { %1253 = vmatpush3.bf16.msra.mxu0 %v1405_v12  ;;  %1298 = vmatpush3.bf16.msra.mxu1 %v1405_v12 }
  0xa6   : > { %566 = vxpose.xlu0.b32.end [4/4] (short) %v562_v14, 128  ;;  %706 = vxpose.xlu1.b32.end [4/4] (short) %v702_v15, 128 }
  0xdd   : > { %v280_v16 = vpop.trf.xlu0  ;;  %v439_v17 = vpop.trf.xlu1 }
  0xde   : > { %297 = vst.msk [vmem:[#allocation2] sm:$0xff] %vm296_vm0, %v280_v16 }
  0xe1   : > { %v281_v18 = vpop.trf.xlu0  ;;  %v440_v19 = vpop.trf.xlu1 }
  0xe2   : > { %298 = vst.msk [vmem:[#allocation2 + $0x8] sm:$0xff] %vm296_vm0, %v281_v18 }
  0xe5   : > { %v282_v20 = vpop.trf.xlu0  ;;  %v441_v21 = vpop.trf.xlu1 }
  0xe6   : > { %299 = vst.msk [vmem:[#allocation2 + $0x10] sm:$0xff] %vm296_vm0, %v282_v20 }
  0xe9   : > { %v283_v22 = vpop.trf.xlu0  ;;  %v442_v23 = vpop.trf.xlu1 }
  0xea   : > { %300 = vst.msk [vmem:[#allocation2 + $0x18] sm:$0xff] %vm296_vm0, %v283_v22 }
  0xed   : > { %v284_v24 = vpop.trf.xlu0  ;;  %v443_v25 = vpop.trf.xlu1 }
  0xee   : > { %301 = vst.msk [vmem:[#allocation2 + $0x20] sm:$0xff] %vm296_vm0, %v284_v24 }
  0xf1   : > { %v1707_v26 = vld [vmem:[#allocation2] ss:$8 sm:$0xf]  ;;  %v1709_v27 = vld [vmem:[#allocation2 + $0x1] ss:$8 sm:$0xf]  ;;  %v285_v28 = vpop.trf.xlu0  ;;  %v444_v29 = vpop.trf.xlu1 }
  0xf2   : > { %v1711_v30 = vld [vmem:[#allocation2 + $0x2] ss:$8 sm:$0xf]  ;;  %v1713_v31 = vld [vmem:[#allocation2 + $0x3] ss:$8 sm:$0xf] }
  0xf3   : > { %302 = vst.msk [vmem:[#allocation2 + $0x28] sm:$0xff] %vm296_vm0, %v285_v28  ;;  %v1716_v32 = vld [vmem:[#allocation2 + $0x4] ss:$8 sm:$0xf] }
  0xf4   : > { %v1718_v33 = vld [vmem:[#allocation2 + $0x5] ss:$8 sm:$0xf]  ;;  %v1720_v34 = vld [vmem:[#allocation2 + $0x6] ss:$8 sm:$0xf] }
  0xf5   : > { %v1722_v35 = vld [vmem:[#allocation2 + $0x7] ss:$8 sm:$0xf]  ;;  %v286_v36 = vpop.trf.xlu0  ;;  %v445_v37 = vpop.trf.xlu1 }
  0xf6   : > { %455 = vst.msk [vmem:[#allocation2] sm:$0xff] %vm296_vm0, %v439_v17  ;;  %456 = vst.msk [vmem:[#allocation2 + $0x8] sm:$0xff] %vm296_vm0, %v440_v19 }
  0xf7   : > { %457 = vst.msk [vmem:[#allocation2 + $0x10] sm:$0xff] %vm296_vm0, %v441_v21  ;;  %458 = vst.msk [vmem:[#allocation2 + $0x18] sm:$0xff] %vm296_vm0, %v442_v23 }
  0xf8   : > { %303 = vst.msk [vmem:[#allocation2 + $0x30] sm:$0xff] %vm296_vm0, %v286_v36 }
  0xf9   : > { %v287_v38 = vpop.trf.xlu0  ;;  %v446_v39 = vpop.trf.xlu1 }
  0xfa   : > { %304 = vst.msk [vmem:[#allocation2 + $0x38] sm:$0xff] %vm296_vm0, %v287_v38 }
  0xfd   : > { %v288_v40 = vpop.trf.xlu0  ;;  %v1730_v41 = vpop.trf.xlu1 }
  0xfe   : > { %305 = vst.msk [vmem:[#allocation2 + $0x40] sm:$0xff] %vm296_vm0, %v288_v40  ;;  %v1757_v59 = vld [vmem:[#allocation2 + $0x1] ss:$8 sm:$0xf] }
  0xff   : > { %v1760_v61 = vld [vmem:[#allocation2 + $0x2] ss:$8 sm:$0xf]  ;;  %v1762_v62 = vld [vmem:[#allocation2 + $0x3] ss:$8 sm:$0xf] }
 0x100   : > { %2125 = vst [vmem:[#allocation13_spill] sm:$0xff] %v1760_v61  ;;  %v1764_v0 = vld [vmem:[#allocation2 + $0x5] ss:$8 sm:$0xf] }
 0x101   : > { %v1733_v42 = vld [vmem:[#allocation2] ss:$8 sm:$0xf0]  ;;  %v1735_v43 = vld [vmem:[#allocation2 + $0x1] ss:$8 sm:$0xf0]  ;;  %v289_v44 = vpop.trf.xlu0  ;;  %v1737_v45 = vpop.trf.xlu1 }
 0x102   : > { %v1739_v46 = vld [vmem:[#allocation2 + $0x2] ss:$8 sm:$0xf0]  ;;  %v1741_v47 = vld [vmem:[#allocation2 + $0x3] ss:$8 sm:$0xf0]  ;;  %v325_v60 = vor.u32 %v1735_v43, %v1709_v27 }
 0x103   : > { %306 = vst.msk [vmem:[#allocation2 + $0x48] sm:$0xff] %vm296_vm0, %v289_v44  ;;  %v1744_v48 = vld [vmem:[#allocation2 + $0x4] ss:$8 sm:$0xf0] }
 0x104   : > { %v1746_v49 = vld [vmem:[#allocation2 + $0x5] ss:$8 sm:$0xf0]  ;;  %v1748_v50 = vld [vmem:[#allocation2 + $0x6] ss:$8 sm:$0xf0]  ;;  %v370_v43 = vor.u32 %v1744_v48, %v1716_v32 }
 0x105   : > { %v1750_v51 = vld [vmem:[#allocation2 + $0x7] ss:$8 sm:$0xf0]  ;;  %v290_v52 = vpop.trf.xlu0  ;;  %v449_v53 = vpop.trf.xlu1  ;;  %v1768_v2 = vld [vmem:[#allocation2 + $0x6] ss:$8 sm:$0xf]  ;;  %v380_v27 = vor.u32 %v1746_v49, %v1718_v33 }
 0x106   : > { %459 = vst.msk [vmem:[#allocation2 + $0x20] sm:$0xff] %vm296_vm0, %v443_v25  ;;  %460 = vst.msk [vmem:[#allocation2 + $0x28] sm:$0xff] %vm296_vm0, %v444_v29  ;;  %v1770_v3 = vld [vmem:[#allocation2 + $0x7] ss:$8 sm:$0xf] }
 0x107   : > { %461 = vst.msk [vmem:[#allocation2 + $0x30] sm:$0xff] %vm296_vm0, %v445_v37  ;;  %462 = vst.msk [vmem:[#allocation2 + $0x38] sm:$0xff] %vm296_vm0, %v446_v39  ;;  %v1406_v40 = vld [vmem:[#allocation6 + $0x58] sm:$0xff]   ;;  %v1410_v48 = vld [vmem:[#allocation6 + $0x68] sm:$0xff]  }
 0x108   : > { %307 = vst.msk [vmem:[#allocation2 + $0x50] sm:$0xff] %vm296_vm0, %v290_v52  ;;  %v1407_v44 = vld [vmem:[#allocation6 + $0x18] sm:$0xff]   ;;  %1254 = vmatprep.subr.bf16.mxu0 %v1406_v40  ;;  %1291 = vmatprep.subr.bf16.mxu1 %v1406_v40  ;;  %v1411_v49 = vld [vmem:[#allocation6 + $0x28] sm:$0xff]  }
 0x109   : > { %v291_v57 = vpop.trf.xlu0  ;;  %v450_v58 = vpop.trf.xlu1  ;;  %v1818_v52 = vld [vmem:[#allocation2] ss:$8 sm:$0xf]  ;;  %1255 = vmatpush3.bf16.msra.mxu0 %v1407_v44  ;;  %1299 = vmatpush3.bf16.msra.mxu1 %v1407_v44 }
 0x10a   : > { %308 = vst.msk [vmem:[#allocation2 + $0x58] sm:$0xff] %vm296_vm0, %v291_v57 }
 0x10d   : > { %v292_v6 = vpop.trf.xlu0  ;;  %v1776_v7 = vpop.trf.xlu1 }
 0x10e   : > { %v1766_v1 = vld [vmem:[#allocation2 + $0x1] ss:$8 sm:$0xf0]  ;;  %v1772_v4 = vld [vmem:[#allocation2 + $0x2] ss:$8 sm:$0xf0] }
 0x10f   : > { %v1774_v5 = vld [vmem:[#allocation2 + $0x3] ss:$8 sm:$0xf0]  ;;  %v1780_v9 = vld [vmem:[#allocation2 + $0x5] ss:$8 sm:$0xf0] }
 0x110   : > { %309 = vst.msk [vmem:[#allocation2 + $0x60] sm:$0xff] %vm296_vm0, %v292_v6  ;;  %v505_v11 = vor.u32 %v1774_v5, %v1762_v62  ;;  %v1787_v13 = vld [vmem:[#allocation2 + $0x6] ss:$8 sm:$0xf0] }
 0x111   : > { %v1789_v14 = vld [vmem:[#allocation2 + $0x7] ss:$8 sm:$0xf0]  ;;  %v317_v18 = vld [vmem:[#allocation2 + $0x40] ss:$8 sm:$0xf]  ;;  %v293_v20 = vpop.trf.xlu0  ;;  %v452_v21 = vpop.trf.xlu1 }
 0x112   : > { %v327_v19 = vld [vmem:[#allocation2 + $0x41] ss:$8 sm:$0xf]  ;;  %v1797_v22 = vld [vmem:[#allocation2 + $0x42] ss:$8 sm:$0xf] }
 0x113   : > { %v1799_v23 = vld [vmem:[#allocation2 + $0x43] ss:$8 sm:$0xf]  ;;  %310 = vst.msk [vmem:[#allocation2 + $0x68] sm:$0xff] %vm296_vm0, %v293_v20 }
 0x114   : > { %v1802_v24 = vld [vmem:[#allocation2 + $0x44] ss:$8 sm:$0xf]  ;;  %v1804_v25 = vld [vmem:[#allocation2 + $0x45] ss:$8 sm:$0xf] }
 0x115   : > { %v1806_v28 = vld [vmem:[#allocation2 + $0x46] ss:$8 sm:$0xf]  ;;  %v1808_v29 = vld [vmem:[#allocation2 + $0x47] ss:$8 sm:$0xf]  ;;  %v294_v36 = vpop.trf.xlu0  ;;  %v453_v37 = vpop.trf.xlu1 }
 0x116   : > { %463 = vst.msk [vmem:[#allocation2 + $0x40] sm:$0xff] %vm296_vm0, %v1730_v41  ;;  %464 = vst.msk [vmem:[#allocation2 + $0x48] sm:$0xff] %vm296_vm0, %v1737_v45  ;;  %v1820_v41 = vld [vmem:[#allocation2 + $0x4] ss:$8 sm:$0xf] }
 0x117   : > { %465 = vst.msk [vmem:[#allocation2 + $0x50] sm:$0xff] %vm296_vm0, %v449_v53  ;;  %466 = vst.msk [vmem:[#allocation2 + $0x58] sm:$0xff] %vm296_vm0, %v450_v58  ;;  %v1408_v53 = vld [vmem:[#allocation6 + $0x60] sm:$0xff]  }
 0x118   : > { %311 = vst.msk [vmem:[#allocation2 + $0x70] sm:$0xff] %vm296_vm0, %v294_v36  ;;  %v315_v36 = vor.u32 %v1733_v42, %v1707_v26  ;;  %1256 = vmatprep.subr.bf16.mxu0 %v1408_v53  ;;  %1292 = vmatprep.subr.bf16.mxu1 %v1408_v53  ;;  %v472_v53 = vld [vmem:[#allocation2] ss:$8 sm:$0xf0] }
 0x119   : > { %v295_v38 = vpop.trf.xlu0  ;;  %v454_v39 = vpop.trf.xlu1  ;;  %1257 = vmatpush3.bf16.msra.mxu0 %v1409_v55  ;;  %1300 = vmatpush3.bf16.msra.mxu1 %v1409_v55 }
 0x11a   : > { %312 = vst.msk [vmem:[#allocation2 + $0x78] sm:$0xff] %vm296_vm0, %v295_v38  ;;  %1258 = vmatprep.subr.bf16.mxu0 %v1410_v48  ;;  %1293 = vmatprep.subr.bf16.mxu1 %v1410_v48 }
 0x11d   : > { %v579_v54 = vpop.trf.xlu0  ;;  %v1822_v45 = vpop.trf.xlu1  ;;  %1259 = vmatpush3.bf16.msra.mxu0 %v1411_v49  ;;  %1301 = vmatpush3.bf16.msra.mxu1 %v1411_v49 }
 0x11e   : > { %595 = vst.msk [vmem:[#allocation2] sm:$0xff] %vm296_vm0, %v579_v54 }
 0x121   : > { %v318_v56 = vld [vmem:[#allocation2 + $0x40] ss:$8 sm:$0xf0]  ;;  %v328_v57 = vld [vmem:[#allocation2 + $0x41] ss:$8 sm:$0xf0]  ;;  %v580_v58 = vpop.trf.xlu0  ;;  %v1827_v63 = vpop.trf.xlu1 }
 0x122   : > { %v1829_v6 = vld [vmem:[#allocation2 + $0x42] ss:$8 sm:$0xf0]  ;;  %v1831_v12 = vld [vmem:[#allocation2 + $0x43] ss:$8 sm:$0xf0]  ;;  %v329_v20 = vor.u32 %v328_v57, %v327_v19  ;;  %v319_v38 = vor.u32 %v318_v56, %v317_v18 }
 0x123   : > { %596 = vst.msk [vmem:[#allocation2 + $0x8] sm:$0xff] %vm296_vm0, %v580_v58  ;;  %v373_v40 = vld [vmem:[#allocation2 + $0x44] ss:$8 sm:$0xf0] }
 0x124   : > { %v383_v44 = vld [vmem:[#allocation2 + $0x45] ss:$8 sm:$0xf0]  ;;  %v397_v54 = vld [vmem:[#allocation2 + $0x46] ss:$8 sm:$0xf0]  ;;  %v330_v57 = vpack.c.bf16 %v329_v20, %v325_v60  ;;  %v320_v58 = vpack.c.bf16 %v319_v38, %v315_v36  ;;  %v374_v26 = vor.u32 %v373_v40, %v1802_v24 }
 0x125   : > { %v411_v10 = vld [vmem:[#allocation2 + $0x47] ss:$8 sm:$0xf0]  ;;  %v384_v19 = vor.u32 %v383_v44, %v1804_v25  ;;  %v581_v32 = vpop.trf.xlu0  ;;  %v398_v33 = vor.u32 %v397_v54, %v1806_v28  ;;  %v1848_v42 = vpop.trf.xlu1  ;;  %v408_v28 = vor.u32 %v1750_v51, %v1722_v35  ;;  %v340_v35 = vor.u32 %v1739_v46, %v1711_v30  ;;  %v516_v51 = vld [vmem:[#allocation2 + $0x4] ss:$8 sm:$0xf0] }
 0x126   : > { %467 = vst.msk [vmem:[#allocation2 + $0x60] sm:$0xff] %vm296_vm0, %v1776_v7  ;;  %468 = vst.msk [vmem:[#allocation2 + $0x68] sm:$0xff] %vm296_vm0, %v452_v21  ;;  %v1412_v18 = vld [vmem:[#allocation6 + $0x70] sm:$0xff]   ;;  %332 = vrot.lane.b32.xlu1 %v330_v57, %s1525_s1  ;;  %v412_v7 = vor.u32 %v411_v10, %v1808_v29  ;;  %v394_v21 = vor.u32 %v1748_v50, %v1720_v34  ;;  %v375_v25 = vpack.c.bf16 %v374_v26, %v370_v43  ;;  %v1414_v50 = vld [vmem:[#allocation6 + $0x78] sm:$0xff]  }
 0x127   : > { %469 = vst.msk [vmem:[#allocation2 + $0x70] sm:$0xff] %vm296_vm0, %v453_v37  ;;  %470 = vst.msk [vmem:[#allocation2 + $0x78] sm:$0xff] %vm296_vm0, %v454_v39  ;;  %v385_v24 = vpack.c.bf16 %v384_v19, %v380_v27  ;;  %v344_v39 = vor.u32 %v1829_v6, %v1797_v22  ;;  %v1413_v10 = vld [vmem:[#allocation6 + $0x30] sm:$0xff]   ;;  %1260 = vmatprep.subr.bf16.mxu0 %v1412_v18  ;;  %1294 = vmatprep.subr.bf16.mxu1 %v1412_v18  ;;  %v1415_v20 = vld [vmem:[#allocation6 + $0x38] sm:$0xff]  }
 0x128   : > { %597 = vst.msk [vmem:[#allocation2 + $0x10] sm:$0xff] %vm296_vm0, %v581_v32  ;;  %321 = vst.msk [vmem:[#allocation3] sm:$0xff] %vm296_vm0, %v320_v58  ;;  %v399_v37 = vpack.c.bf16 %v398_v33, %v394_v21  ;;  %v413_v55 = vpack.c.bf16 %v412_v7, %v408_v28  ;;  %v474_v22 = vld [vmem:[#allocation2 + $0x40] ss:$8 sm:$0xf]  ;;  %v359_v6 = vor.u32 %v1831_v12, %v1799_v23  ;;  %1261 = vmatpush3.bf16.msra.mxu0 %v1413_v10 }
 0x129   : > { %387 = vrot.lane.b32.xlu0 %v385_v24, %s1525_s1  ;;  %376 = vst.msk [vmem:[#allocation3 + $0x8] sm:$0xff] %vm296_vm0, %v375_v25  ;;  %v582_v29 = vpop.trf.xlu0  ;;  %v722_v34 = vpop.trf.xlu1  ;;  %v345_v60 = vpack.c.bf16 %v344_v39, %v340_v35  ;;  %v506_v36 = vld [vmem:[#allocation2 + $0x43] ss:$8 sm:$0xf]  ;;  %1262 = vmatprep.subr.bf16.mxu0 %v1414_v50  ;;  %v473_v30 = vor.u32 %v472_v53, %v1818_v52 }
 0x12a   : > { %598 = vst.msk [vmem:[#allocation2 + $0x18] sm:$0xff] %vm296_vm0, %v582_v29  ;;  %401 = vrot.lane.b32.xlu1 %v399_v37, %s1526_s25  ;;  %1302 = vmatpush3.bf16.msra.mxu1 %v1413_v10  ;;  %v518_v27 = vld [vmem:[#allocation2 + $0x44] ss:$8 sm:$0xf]  ;;  %v355_v23 = vor.u32 %v1741_v47, %v1713_v31  ;;  %v517_v54 = vor.u32 %v516_v51, %v1820_v41 }
 0x12b   : > { %1295 = vmatprep.subr.bf16.mxu1 %v1414_v50  ;;  %v1911_v25 = vld [vmem:[#allocation2 + $0x41] ss:$8 sm:$0xf]  ;;  %v1913_v28 = vld [vmem:[#allocation2 + $0x42] ss:$8 sm:$0xf] }
 0x12c   : > { %v360_v58 = vpack.c.bf16 %v359_v6, %v355_v23  ;;  %1263 = vmatpush3.bf16.msra.mxu0 %v1415_v20  ;;  %v1915_v37 = vld [vmem:[#allocation2 + $0x45] ss:$8 sm:$0xf] }
 0x12d   : > { %415 = vrot.lane.b32.xlu0 %v413_v55, %s1527_s26  ;;  %v583_v40 = vpop.trf.xlu0  ;;  %v1869_v44 = vpop.trf.xlu1 }
 0x12e   : > { %v475_v56 = vld [vmem:[#allocation2 + $0x40] ss:$8 sm:$0xf0]  ;;  %v507_v38 = vld [vmem:[#allocation2 + $0x43] ss:$8 sm:$0xf0]  ;;  %347 = vrot.lane.b32.xlu1 %v345_v60, %s1526_s25  ;;  %1303 = vmatpush3.bf16.msra.mxu1 %v1415_v20 }
 0x12f   : > { %v476_v46 = vor.u32 %v475_v56, %v474_v22  ;;  %v519_v43 = vld [vmem:[#allocation2 + $0x44] ss:$8 sm:$0xf0]  ;;  %599 = vst.msk [vmem:[#allocation2 + $0x20] sm:$0xff] %vm296_vm0, %v583_v40  ;;  %v508_v12 = vor.u32 %v507_v38, %v506_v36 }
 0x130   : > { %v520_v19 = vor.u32 %v519_v43, %v518_v27  ;;  %v1944_v38 = vld [vmem:[#allocation2 + $0x41] ss:$8 sm:$0xf0]  ;;  %v1946_v40 = vld [vmem:[#allocation2 + $0x42] ss:$8 sm:$0xf0] }
 0x131   : > { %v477_v57 = vpack.c.bf16 %v476_v46, %v473_v30  ;;  %v1880_v52 = vpack.c.bf16 %v508_v12, %v505_v11  ;;  %v584_v26 = vpop.trf.xlu0  ;;  %v724_v32 = vpop.trf.xlu1  ;;  %v1882_v33 = vld [vmem:[#allocation2] ss:$8 sm:$0xf]  ;;  %v1884_v48 = vld [vmem:[#allocation2 + $0x4] ss:$8 sm:$0xf] }
 0x132   : > { %v521_v31 = vpack.c.bf16 %v520_v19, %v517_v54  ;;  %600 = vst.msk [vmem:[#allocation2 + $0x28] sm:$0xff] %vm296_vm0, %v584_v26  ;;  %362 = vrot.lane.b32.xlu1 %v360_v58, %s1527_s26  ;;  %v1889_v47 = vld [vmem:[#allocation2 + $0x6] ss:$8 sm:$0xf] }
 0x133   : > { %2126 = vst [vmem:[#allocation14_spill] sm:$0xff] %v1880_v52  ;;  %478 = vst.msk [vmem:[#allocation3 + $0x10] sm:$0xff] %vm296_vm0, %v477_v57  ;;  %v1891_v62 = vld [vmem:[#allocation2 + $0x5] ss:$8 sm:$0xf] }
 0x134   : > { %v1893_v5 = vld [vmem:[#allocation2 + $0x7] ss:$8 sm:$0xf]  ;;  %v1895_v11 = vld [vmem:[#allocation2 + $0x1] ss:$8 sm:$0xf] }
 0x135   : > { %522 = vst.msk [vmem:[#allocation3 + $0x18] sm:$0xff] %vm296_vm0, %v521_v31  ;;  %v1898_v41 = vld [vmem:[#allocation2 + $0x3] ss:$8 sm:$0xf]  ;;  %v585_v18 = vpop.trf.xlu0  ;;  %v725_v24 = vpop.trf.xlu1 }
 0x136   : > { %v1900_v49 = vld [vmem:[#allocation2 + $0x2] ss:$8 sm:$0xf]  ;;  %601 = vst.msk [vmem:[#allocation2 + $0x30] sm:$0xff] %vm296_vm0, %v585_v18 }
 0x137   : > { %735 = vst.msk [vmem:[#allocation2] sm:$0xff] %vm296_vm0, %v1822_v45  ;;  %736 = vst.msk [vmem:[#allocation2 + $0x8] sm:$0xff] %vm296_vm0, %v1827_v63  ;;  %v1917_v45 = vld [vmem:[#allocation2 + $0x46] ss:$8 sm:$0xf] }
 0x138   : > { %737 = vst.msk [vmem:[#allocation2 + $0x10] sm:$0xff] %vm296_vm0, %v1848_v42  ;;  %738 = vst.msk [vmem:[#allocation2 + $0x18] sm:$0xff] %vm296_vm0, %v722_v34  ;;  %v1919_v63 = vld [vmem:[#allocation2 + $0x47] ss:$8 sm:$0xf] }
 0x139   : > { %v586_v7 = vpop.trf.xlu0  ;;  %v726_v21 = vpop.trf.xlu1  ;;  %v1948_v30 = vld [vmem:[#allocation2 + $0x45] ss:$8 sm:$0xf0]  ;;  %v1950_v46 = vld [vmem:[#allocation2 + $0x46] ss:$8 sm:$0xf0] }
 0x13a   : > { %602 = vst.msk [vmem:[#allocation2 + $0x38] sm:$0xff] %vm296_vm0, %v586_v7 }
 0x13d   : > { %v587_v39 = vpop.trf.xlu0  ;;  %v727_v42 = vpop.trf.xlu1 }
 0x13e   : > { %603 = vst.msk [vmem:[#allocation2 + $0x40] sm:$0xff] %vm296_vm0, %v587_v39 }
 0x141   : > { %v588_v10 = vpop.trf.xlu0  ;;  %v728_v29 = vpop.trf.xlu1  ;;  %v1922_v34 = vld [vmem:[#allocation2] ss:$8 sm:$0xf0]  ;;  %v1924_v50 = vld [vmem:[#allocation2 + $0x4] ss:$8 sm:$0xf0] }
 0x142   : > { %604 = vst.msk [vmem:[#allocation2 + $0x48] sm:$0xff] %vm296_vm0, %v588_v10  ;;  %v676_v53 = vld [vmem:[#allocation2 + $0x6] ss:$8 sm:$0xf0] }
 0x143   : > { %v1927_v55 = vld [vmem:[#allocation2 + $0x5] ss:$8 sm:$0xf0]  ;;  %v1929_v35 = vld [vmem:[#allocation2 + $0x7] ss:$8 sm:$0xf0] }
 0x144   : > { %v1931_v51 = vld [vmem:[#allocation2 + $0x1] ss:$8 sm:$0xf0]  ;;  %v1933_v22 = vld [vmem:[#allocation2 + $0x3] ss:$8 sm:$0xf0] }
 0x145   : > { %v1935_v56 = vld [vmem:[#allocation2 + $0x2] ss:$8 sm:$0xf0]  ;;  %v589_v60 = vpop.trf.xlu0  ;;  %v729_v6 = vpop.trf.xlu1 }
 0x146   : > { %739 = vst.msk [vmem:[#allocation2 + $0x20] sm:$0xff] %vm296_vm0, %v1869_v44  ;;  %740 = vst.msk [vmem:[#allocation2 + $0x28] sm:$0xff] %vm296_vm0, %v724_v32  ;;  %v1952_v44 = vld [vmem:[#allocation2 + $0x47] ss:$8 sm:$0xf0] }
 0x147   : > { %741 = vst.msk [vmem:[#allocation2 + $0x30] sm:$0xff] %vm296_vm0, %v725_v24  ;;  %742 = vst.msk [vmem:[#allocation2 + $0x38] sm:$0xff] %vm296_vm0, %v726_v21 }
 0x148   : > { %605 = vst.msk [vmem:[#allocation2 + $0x50] sm:$0xff] %vm296_vm0, %v589_v60 }
 0x149   : > { %v590_v20 = vpop.trf.xlu0  ;;  %v730_v36 = vpop.trf.xlu1 }
 0x14a   : > { %606 = vst.msk [vmem:[#allocation2 + $0x58] sm:$0xff] %vm296_vm0, %v590_v20  ;;  %v677_v20 = vor.u32 %v676_v53, %v1889_v47 }
 0x14d   : > { %v591_v27 = vpop.trf.xlu0  ;;  %v731_v43 = vpop.trf.xlu1 }
 0x14e   : > { %607 = vst.msk [vmem:[#allocation2 + $0x60] sm:$0xff] %vm296_vm0, %v591_v27 }
 0x151   : > { %v592_v23 = vpop.trf.xlu0  ;;  %v614_v12 = vld [vmem:[#allocation2 + $0x40] ss:$8 sm:$0xf]  ;;  %v658_v54 = vld [vmem:[#allocation2 + $0x44] ss:$8 sm:$0xf]  ;;  %v732_v24 = vpop.trf.xlu1 }
 0x152   : > { %608 = vst.msk [vmem:[#allocation2 + $0x68] sm:$0xff] %vm296_vm0, %v592_v23  ;;  %v678_v19 = vld [vmem:[#allocation2 + $0x46] ss:$8 sm:$0xf] }
 0x153   : > { %v666_v57 = vld [vmem:[#allocation2 + $0x45] ss:$8 sm:$0xf]  ;;  %v690_v58 = vld [vmem:[#allocation2 + $0x47] ss:$8 sm:$0xf] }
 0x154   : > { %v622_v26 = vld [vmem:[#allocation2 + $0x41] ss:$8 sm:$0xf]  ;;  %v646_v32 = vld [vmem:[#allocation2 + $0x43] ss:$8 sm:$0xf] }
 0x155   : > { %v634_v31 = vld [vmem:[#allocation2 + $0x42] ss:$8 sm:$0xf]  ;;  %v593_v18 = vpop.trf.xlu0  ;;  %v733_v21 = vpop.trf.xlu1 }
 0x156   : > { %743 = vst.msk [vmem:[#allocation2 + $0x40] sm:$0xff] %vm296_vm0, %v727_v42  ;;  %744 = vst.msk [vmem:[#allocation2 + $0x48] sm:$0xff] %vm296_vm0, %v728_v29  ;;  %v613_v29 = vor.u32 %v1922_v34, %v1882_v33 }
 0x157   : > { %745 = vst.msk [vmem:[#allocation2 + $0x50] sm:$0xff] %vm296_vm0, %v729_v6  ;;  %746 = vst.msk [vmem:[#allocation2 + $0x58] sm:$0xff] %vm296_vm0, %v730_v36  ;;  %v665_v36 = vor.u32 %v1927_v55, %v1891_v62  ;;  %v804_v55 = vld [vmem:[#allocation2 + $0x5] ss:$8 sm:$0xf0] }
 0x158   : > { %609 = vst.msk [vmem:[#allocation2 + $0x70] sm:$0xff] %vm296_vm0, %v593_v18 }
 0x159   : > { %v594_v7 = vpop.trf.xlu0  ;;  %v734_v60 = vpop.trf.xlu1 }
 0x15a   : > { %610 = vst.msk [vmem:[#allocation2 + $0x78] sm:$0xff] %vm296_vm0, %v594_v7  ;;  %v657_v7 = vor.u32 %v1924_v50, %v1884_v48  ;;  %v689_v48 = vor.u32 %v1929_v35, %v1893_v5  ;;  %v803_v5 = vld [vmem:[#allocation2 + $0x5] ss:$8 sm:$0xf] }
 0x15b   : > { %v796_v35 = vld [vmem:[#allocation2 + $0x4] ss:$8 sm:$0xf0] }
 0x161   : > { %v679_v39 = vld [vmem:[#allocation2 + $0x46] ss:$8 sm:$0xf0]  ;;  %v615_v10 = vld [vmem:[#allocation2 + $0x40] ss:$8 sm:$0xf0] }
 0x162   : > { %v680_v27 = vor.u32 %v679_v39, %v678_v19  ;;  %v659_v42 = vld [vmem:[#allocation2 + $0x44] ss:$8 sm:$0xf0]  ;;  %v667_v23 = vld [vmem:[#allocation2 + $0x45] ss:$8 sm:$0xf0]  ;;  %v616_v6 = vor.u32 %v615_v10, %v614_v12 }
 0x163   : > { %v668_v18 = vor.u32 %v667_v23, %v666_v57  ;;  %v691_v17 = vld [vmem:[#allocation2 + $0x47] ss:$8 sm:$0xf0]  ;;  %v623_v8 = vld [vmem:[#allocation2 + $0x41] ss:$8 sm:$0xf0]  ;;  %v660_v16 = vor.u32 %v659_v42, %v658_v54 }
 0x164   : > { %v681_v15 = vpack.c.bf16 %v680_v27, %v677_v20  ;;  %v692_v52 = vor.u32 %v691_v17, %v690_v58  ;;  %v647_v47 = vld [vmem:[#allocation2 + $0x43] ss:$8 sm:$0xf0]  ;;  %v635_v53 = vld [vmem:[#allocation2 + $0x42] ss:$8 sm:$0xf0]  ;;  %v617_v19 = vpack.c.bf16 %v616_v6, %v613_v29  ;;  %v624_v61 = vor.u32 %v623_v8, %v622_v26 }
 0x165   : > { %v669_v39 = vpack.c.bf16 %v668_v18, %v665_v36  ;;  %747 = vst.msk [vmem:[#allocation2 + $0x60] sm:$0xff] %vm296_vm0, %v731_v43  ;;  %748 = vst.msk [vmem:[#allocation2 + $0x68] sm:$0xff] %vm296_vm0, %v732_v24  ;;  %v661_v33 = vpack.c.bf16 %v660_v16, %v657_v7  ;;  %v621_v8 = vor.u32 %v1931_v51, %v1895_v11  ;;  %v806_v51 = vld [vmem:[#allocation2 + $0x45] ss:$8 sm:$0xf] }
 0x166   : > { %749 = vst.msk [vmem:[#allocation2 + $0x70] sm:$0xff] %vm296_vm0, %v733_v21  ;;  %750 = vst.msk [vmem:[#allocation2 + $0x78] sm:$0xff] %vm296_vm0, %v734_v60  ;;  %683 = vrot.lane.b32.xlu0 %v681_v15, %s1526_s25  ;;  %v693_v17 = vpack.c.bf16 %v692_v52, %v689_v48  ;;  %v648_v62 = vor.u32 %v647_v47, %v646_v32  ;;  %v636_v50 = vor.u32 %v635_v53, %v634_v31  ;;  %v795_v52 = vld [vmem:[#allocation2 + $0x4] ss:$8 sm:$0xf] }
 0x167   : > { %618 = vst.msk [vmem:[#allocation3 + $0x20] sm:$0xff] %vm296_vm0, %v617_v19  ;;  %671 = vrot.lane.b32.xlu1 %v669_v39, %s1525_s1  ;;  %662 = vst.msk [vmem:[#allocation3 + $0x28] sm:$0xff] %vm296_vm0, %v661_v33  ;;  %v625_v34 = vpack.c.bf16 %v624_v61, %v621_v8  ;;  %v645_v15 = vor.u32 %v1933_v22, %v1898_v41  ;;  %v633_v16 = vor.u32 %v1935_v56, %v1900_v49  ;;  %v751_v57 = vld [vmem:[#allocation2] ss:$8 sm:$0xf] }
 0x168   : > { %v528_v61 = vor.u32 %v1948_v30, %v1915_v37  ;;  %v752_v58 = vld [vmem:[#allocation2] ss:$8 sm:$0xf0]  ;;  %v805_v41 = vor.u32 %v804_v55, %v803_v5  ;;  %v798_v22 = vld [vmem:[#allocation2 + $0x44] ss:$8 sm:$0xf]  ;;  %v540_v49 = vor.u32 %v1950_v46, %v1917_v45  ;;  %v797_v56 = vor.u32 %v796_v35, %v795_v52 }
 0x169   : > { %v649_v11 = vpack.c.bf16 %v648_v62, %v645_v15  ;;  %v637_v12 = vpack.c.bf16 %v636_v50, %v633_v16  ;;  %v754_v26 = vld [vmem:[#allocation2 + $0x40] ss:$8 sm:$0xf]  ;;  %v753_v10 = vor.u32 %v752_v58, %v751_v57  ;;  %v2127_v30 = vor.u32 %v1780_v9, %v1764_v0  ;;  %v816_v46 = vld [vmem:[#allocation2 + $0x6] ss:$8 sm:$0xf0] }
 0x16a   : > { %695 = vrot.lane.b32.xlu0 %v693_v17, %s1527_s26  ;;  %v484_v20 = vor.u32 %v1944_v38, %v1911_v25  ;;  %v818_v29 = vld [vmem:[#allocation2 + $0x46] ss:$8 sm:$0xf]  ;;  %v2128_v6 = vor.u32 %v1787_v13, %v1768_v2  ;;  %v760_v0 = vld [vmem:[#allocation2 + $0x1] ss:$8 sm:$0xf0]  ;;  %v2129_v25 = vor.u32 %v1766_v1, %v1757_v59  ;;  %v552_v39 = vor.u32 %v1952_v44, %v1919_v63 }
 0x16b   : > { %627 = vrot.lane.b32.xlu1 %v625_v34, %s1525_s1  ;;  %v529_v60 = vpack.c.bf16 %v528_v61, %v2127_v30  ;;  %v762_v9 = vld [vmem:[#allocation2 + $0x41] ss:$8 sm:$0xf]  ;;  %v815_v7 = vld [vmem:[#allocation2 + $0x6] ss:$8 sm:$0xf]  ;;  %v496_v48 = vor.u32 %v1946_v40, %v1913_v28  ;;  %v2130_v62 = vor.u32 %v1789_v14, %v1770_v3 }
 0x16c   : > { %v541_v36 = vpack.c.bf16 %v540_v49, %v2128_v6  ;;  %v485_v38 = vpack.c.bf16 %v484_v20, %v2129_v25  ;;  %v817_v53 = vor.u32 %v816_v46, %v815_v7  ;;  %v759_v19 = vld [vmem:[#allocation2 + $0x1] ss:$8 sm:$0xf]  ;;  %v828_v1 = vld [vmem:[#allocation2 + $0x7] ss:$8 sm:$0xf0] }
 0x16d   : > { %v807_v43 = vld [vmem:[#allocation2 + $0x45] ss:$8 sm:$0xf0]  ;;  %v799_v32 = vld [vmem:[#allocation2 + $0x44] ss:$8 sm:$0xf0]  ;;  %v761_v2 = vor.u32 %v760_v0, %v759_v19  ;;  %v553_v34 = vpack.c.bf16 %v552_v39, %v2130_v62 }
 0x16e   : > { %v808_v54 = vor.u32 %v807_v43, %v806_v51  ;;  %651 = vrot.lane.b32.xlu0 %v649_v11, %s1527_s26  ;;  %v755_v31 = vld [vmem:[#allocation2 + $0x40] ss:$8 sm:$0xf0]  ;;  %v800_v21 = vor.u32 %v799_v32, %v798_v22  ;;  %v819_v27 = vld [vmem:[#allocation2 + $0x46] ss:$8 sm:$0xf0] }
 0x16f   : > { %639 = vrot.lane.b32.xlu1 %v637_v12, %s1526_s25  ;;  %v756_v37 = vor.u32 %v755_v31, %v754_v26  ;;  %v763_v42 = vld [vmem:[#allocation2 + $0x41] ss:$8 sm:$0xf0]  ;;  %v820_v18 = vor.u32 %v819_v27, %v818_v29  ;;  %v831_v8 = vld [vmem:[#allocation2 + $0x47] ss:$8 sm:$0xf0] }
 0x170   : > { %v809_v24 = vpack.c.bf16 %v808_v54, %v805_v41  ;;  %v801_v23 = vpack.c.bf16 %v800_v21, %v797_v56  ;;  %v764_v47 = vor.u32 %v763_v42, %v762_v9  ;;  %v775_v59 = vld [vmem:[#allocation2 + $0x42] ss:$8 sm:$0xf0]  ;;  %v830_v17 = vld [vmem:[#allocation2 + $0x47] ss:$8 sm:$0xf] }
 0x171   : > { %v757_v45 = vpack.c.bf16 %v756_v37, %v753_v10  ;;  %v821_v13 = vpack.c.bf16 %v820_v18, %v817_v53  ;;  %v832_v50 = vor.u32 %v831_v8, %v830_v17  ;;  %v772_v15 = vld [vmem:[#allocation2 + $0x2] ss:$8 sm:$0xf0]  ;;  %v827_v28 = vld [vmem:[#allocation2 + $0x7] ss:$8 sm:$0xf] }
 0x172   : > { %811 = vrot.lane.b32.xlu0 %v809_v24, %s1525_s1  ;;  %802 = vst.msk [vmem:[#allocation3 + $0x38] sm:$0xff] %vm296_vm0, %v801_v23  ;;  %v765_v33 = vpack.c.bf16 %v764_v47, %v761_v2  ;;  %v774_v16 = vld [vmem:[#allocation2 + $0x42] ss:$8 sm:$0xf]  ;;  %v829_v35 = vor.u32 %v828_v1, %v827_v28 }
 0x173   : > { %531 = vrot.lane.b32.xlu1 %v529_v60, %s1525_s1  ;;  %758 = vst.msk [vmem:[#allocation3 + $0x30] sm:$0xff] %vm296_vm0, %v757_v45  ;;  %v2131_v63 = vld [vmem:[#allocation13_spill] sm:$0xff]  ;;  %v776_v40 = vor.u32 %v775_v59, %v774_v16  ;;  %v2133_v57 = vld [vmem:[#allocation14_spill] sm:$0xff] }
 0x174   : > { %v2132_v44 = vor.u32 %v1772_v4, %v2131_v63  ;;  %v787_v55 = vld [vmem:[#allocation2 + $0x43] ss:$8 sm:$0xf0]  ;;  %v771_v11 = vld [vmem:[#allocation2 + $0x2] ss:$8 sm:$0xf]  ;;  %v833_v14 = vpack.c.bf16 %v832_v50, %v829_v35 }
 0x175   : > { %v773_v51 = vor.u32 %v772_v15, %v771_v11  ;;  %v784_v43 = vld [vmem:[#allocation2 + $0x3] ss:$8 sm:$0xf0] }
 0x176   : > { %543 = vrot.lane.b32.xlu0 %v541_v36, %s1526_s25  ;;  %v497_v5 = vpack.c.bf16 %v496_v48, %v2132_v44  ;;  %v786_v3 = vld [vmem:[#allocation2 + $0x43] ss:$8 sm:$0xf] }
 0x177   : > { %487 = vrot.lane.b32.xlu1 %v485_v38, %s1525_s1  ;;  %v788_v52 = vor.u32 %v787_v55, %v786_v3  ;;  %v777_v12 = vpack.c.bf16 %v776_v40, %v773_v51  ;;  %v783_v61 = vld [vmem:[#allocation2 + $0x3] ss:$8 sm:$0xf] }
 0x178   : > { %v785_v4 = vor.u32 %v784_v43, %v783_v61 }
 0x17a   : > { %823 = vrot.lane.b32.xlu0 %v821_v13, %s1526_s25  ;;  %v789_v54 = vpack.c.bf16 %v788_v52, %v785_v4  ;;  %v1213_v13 = vld [vmem:[%s2106_s2] ss:$0 sm:$0xff] }
 0x17b   : > { %767 = vrot.lane.b32.xlu1 %v765_v33, %s1525_s1 }
 0x17e   : > { %555 = vrot.lane.b32.xlu0 %v553_v34, %s1527_s26 }
 0x17f   : > { %499 = vrot.lane.b32.xlu1 %v497_v5, %s1526_s25 }
 0x182   : > { %835 = vrot.lane.b32.xlu0 %v833_v14, %s1527_s26 }
 0x183   : > { %779 = vrot.lane.b32.xlu1 %v777_v12, %s1526_s25 }
 0x186   : > { %791 = vrot.lane.b32.xlu0 %v789_v54, %s1527_s26 }
 0x187   : > { %511 = vrot.lane.b32.xlu1 %v2133_v57, %s1527_s26 }
 0x198   : > { %v333_v58 = vpop.permute.xlu1 %332 }
 0x199   : > { %336 = vst.msk [vmem:[#allocation3] sm:$0xff] %vm335_vm1, %v333_v58 }
 0x19b   : > { %v388_v41 = vpop.permute.xlu0 %387 }
 0x19c   : > { %390 = vst.msk [vmem:[#allocation3 + $0x8] sm:$0xff] %vm335_vm1, %v388_v41  ;;  %v402_v22 = vpop.permute.xlu1 %401 }
 0x19d   : > { %404 = vst.msk [vmem:[#allocation3 + $0x8] sm:$0xff] %vm350_vm2, %v402_v22 }
 0x19f   : > { %v416_v26 = vpop.permute.xlu0 %415 }
 0x1a0   : > { %418 = vst.msk [vmem:[#allocation3 + $0x8] sm:$0xff] %vm365_vm3, %v416_v26  ;;  %v348_v49 = vpop.permute.xlu1 %347 }
 0x1a1   : > { %351 = vst.msk [vmem:[#allocation3] sm:$0xff] %vm350_vm2, %v348_v49 }
 0x1a4   : > { %v363_v56 = vpop.permute.xlu1 %362 }
 0x1a5   : > { %366 = vst.msk [vmem:[#allocation3] sm:$0xff] %vm365_vm3, %v363_v56 }
 0x1a7   : > { %v840_v32 = vld [vmem:[#allocation3 + $0x8] sm:$0xff] }
 0x1a8   : > { %1014 = vmatprep.mubr.bf16.mxu0 %v840_v32 }
 0x1ac   : > { %v839_v31 = vld [vmem:[#allocation3] sm:$0xff] }
 0x1ad   : > { %1015 = vmatmul.mubr.bf16.vlgmr.msra.gmra.mrb[0].mxu0 %v839_v31 }
 0x1d8   : > { %v684_v24 = vpop.permute.xlu0 %683 }
 0x1d9   : > { %v672_v21 = vpop.permute.xlu1 %671 }
 0x1da   : > { %674 = vst.msk [vmem:[#allocation3 + $0x28] sm:$0xff] %vm335_vm1, %v672_v21 }
 0x1db   : > { %686 = vst.msk [vmem:[#allocation3 + $0x28] sm:$0xff] %vm350_vm2, %v684_v24 }
 0x1dc   : > { %v696_v10 = vpop.permute.xlu0 %695 }
 0x1dd   : > { %v628_v37 = vpop.permute.xlu1 %627  ;;  %698 = vst.msk [vmem:[#allocation3 + $0x28] sm:$0xff] %vm365_vm3, %v696_v10 }
 0x1de   : > { %630 = vst.msk [vmem:[#allocation3 + $0x20] sm:$0xff] %vm335_vm1, %v628_v37 }
 0x1e0   : > { %v652_v30 = vpop.permute.xlu0 %651 }
 0x1e1   : > { %v640_v60 = vpop.permute.xlu1 %639 }
 0x1e2   : > { %642 = vst.msk [vmem:[#allocation3 + $0x20] sm:$0xff] %vm350_vm2, %v640_v60 }
 0x1e3   : > { %654 = vst.msk [vmem:[#allocation3 + $0x20] sm:$0xff] %vm365_vm3, %v652_v30 }
 0x1e4   : > { %v812_v20 = vpop.permute.xlu0 %811  ;;  %v844_v27 = vld [vmem:[#allocation3 + $0x28] sm:$0xff] }
 0x1e5   : > { %v532_v42 = vpop.permute.xlu1 %531  ;;  %814 = vst.msk [vmem:[#allocation3 + $0x38] sm:$0xff] %vm335_vm1, %v812_v20  ;;  %1030 = vmatprep.mubr.bf16.mxu1 %v844_v27 }
 0x1e6   : > { %534 = vst.msk [vmem:[#allocation3 + $0x18] sm:$0xff] %vm335_vm1, %v532_v42 }
 0x1e8   : > { %v544_v23 = vpop.permute.xlu0 %543 }
 0x1e9   : > { %v488_v45 = vpop.permute.xlu1 %487  ;;  %546 = vst.msk [vmem:[#allocation3 + $0x18] sm:$0xff] %vm350_vm2, %v544_v23 }
 0x1ea   : > { %490 = vst.msk [vmem:[#allocation3 + $0x10] sm:$0xff] %vm335_vm1, %v488_v45  ;;  %v843_v46 = vld [vmem:[#allocation3 + $0x20] sm:$0xff] }
 0x1eb   : > { %1031 = vmatmul.mubr.bf16.vlgmr.msra.gmra.mrb[0].mxu1 %v843_v46 }
 0x1ec   : > { %v824_v29 = vpop.permute.xlu0 %823 }
 0x1ed   : > { %v768_v6 = vpop.permute.xlu1 %767  ;;  %826 = vst.msk [vmem:[#allocation3 + $0x38] sm:$0xff] %vm350_vm2, %v824_v29 }
 0x1ee   : > { %770 = vst.msk [vmem:[#allocation3 + $0x30] sm:$0xff] %vm335_vm1, %v768_v6 }
 0x1f0   : > { %v556_v36 = vpop.permute.xlu0 %555 }
 0x1f1   : > { %v500_v18 = vpop.permute.xlu1 %499  ;;  %558 = vst.msk [vmem:[#allocation3 + $0x18] sm:$0xff] %vm365_vm3, %v556_v36 }
 0x1f2   : > { %502 = vst.msk [vmem:[#allocation3 + $0x10] sm:$0xff] %vm350_vm2, %v500_v18 }
 0x1f4   : > { %v836_v0 = vpop.permute.xlu0 %835 }
 0x1f5   : > { %v780_v9 = vpop.permute.xlu1 %779  ;;  %838 = vst.msk [vmem:[#allocation3 + $0x38] sm:$0xff] %vm365_vm3, %v836_v0 }
 0x1f6   : > { %782 = vst.msk [vmem:[#allocation3 + $0x30] sm:$0xff] %vm350_vm2, %v780_v9 }
 0x1f8   : > { %v792_v25 = vpop.permute.xlu0 %791  ;;  %v842_v38 = vld [vmem:[#allocation3 + $0x18] sm:$0xff] }
 0x1f9   : > { %v512_v7 = vpop.permute.xlu1 %511  ;;  %794 = vst.msk [vmem:[#allocation3 + $0x30] sm:$0xff] %vm365_vm3, %v792_v25  ;;  %1022 = vmatprep.mubr.bf16.mxu0 %v842_v38 }
 0x1fa   : > { %514 = vst.msk [vmem:[#allocation3 + $0x10] sm:$0xff] %vm365_vm3, %v512_v7 }
 0x1fc   : > { %v846_v47 = vld [vmem:[#allocation3 + $0x38] sm:$0xff] }
 0x1fd   : > { %1038 = vmatprep.mubr.bf16.mxu1 %v846_v47 }
 0x200   : > { %v845_v53 = vld [vmem:[#allocation3 + $0x30] sm:$0xff] }
 0x201   : > { %v841_v19 = vld [vmem:[#allocation3 + $0x10] sm:$0xff]  ;;  %1039 = vmatmul.mubr.bf16.gmra.mrb[4].mxu1 %v845_v53 }
 0x202   : > { %1023 = vmatmul.mubr.bf16.gmra.mrb[4].mxu0 %v841_v19 }
 0x280   : > { %v1264_v2 = vpop.f32.mrb[0].mxu0 }
 0x281   : > { %v1265_v39 = vpop.f32.mrb[1].mxu0 }
 0x282   : > { %v1266_v33 = vadd.f32 %v1265_v39, %v1264_v2  ;;  %v1267_v48 = vpop.f32.mrb[2].mxu0 }
 0x283   : > { %v1268_v8 = vpop.f32.mrb[3].mxu0 }
 0x284   : > { %v1017_v59 = vadd.f32 %v1266_v33, %v1213_v13  ;;  %v1269_v1 = vadd.f32 %v1268_v8, %v1267_v48 }
 0x286   : > { %v1240_v17 = vpack.c.bf16 %v1017_v59, %v1017_v59  ;;  %v1020_v62 = vadd.f32 %v1269_v1, %v1213_v13 }
 0x288   : > { %1080 = vst.msk [vmem:[%s2062_s20] sm:$0xf] %vm1079_vm4, %v1240_v17  ;;  %v1241_v34 = vpack.c.bf16 %v1020_v62, %v1020_v62 }
 0x28a   : > { %1081 = vst.msk [vmem:[%s2062_s20 + $0x4] sm:$0xf] %vm1079_vm4, %v1241_v34 }
 0x2be   : > { %v1276_v50 = vpop.f32.mrb[0].mxu1 }
 0x2bf   : > { %v1277_v15 = vpop.f32.mrb[1].mxu1 }
 0x2c0   : > { %v1278_v16 = vadd.f32 %v1277_v15, %v1276_v50  ;;  %v1279_v63 = vpop.f32.mrb[2].mxu1 }
 0x2c1   : > { %v1280_v44 = vpop.f32.mrb[3].mxu1 }
 0x2c2   : > { %v1033_v5 = vadd.f32 %v1278_v16, %v1213_v13  ;;  %v1281_v28 = vadd.f32 %v1280_v44, %v1279_v63 }
 0x2c4   : > { %v1244_v40 = vpack.c.bf16 %v1033_v5, %v1033_v5  ;;  %v1036_v55 = vadd.f32 %v1281_v28, %v1213_v13 }
 0x2c6   : > { %1084 = vst.msk [vmem:[%s2062_s20 + $0x10] sm:$0xf] %vm1079_vm4, %v1244_v40  ;;  %v1245_v35 = vpack.c.bf16 %v1036_v55, %v1036_v55 }
 0x2c8   : > { %1085 = vst.msk [vmem:[%s2062_s20 + $0x14] sm:$0xf] %vm1079_vm4, %v1245_v35 }
 0x2d4   : > { %v1282_v11 = vpop.f32.mrb[4].mxu1 }
 0x2d5   : > { %v1270_v51 = vpop.f32.mrb[4].mxu0  ;;  %v1283_v43 = vpop.f32.mrb[5].mxu1 }
 0x2d6   : > { %v1271_v3 = vpop.f32.mrb[5].mxu0  ;;  %v1284_v14 = vadd.f32 %v1283_v43, %v1282_v11  ;;  %v1285_v52 = vpop.f32.mrb[6].mxu1 }
 0x2d7   : > { %v1272_v12 = vadd.f32 %v1271_v3, %v1270_v51  ;;  %v1273_v61 = vpop.f32.mrb[6].mxu0  ;;  %v1286_v4 = vpop.f32.mrb[7].mxu1 }
 0x2d8   : > { %v1041_v54 = vadd.f32 %v1284_v14, %v1213_v13  ;;  %v1274_v57 = vpop.f32.mrb[7].mxu0  ;;  %v1287_v58 = vadd.f32 %v1286_v4, %v1285_v52 }
 0x2d9   : > { %v1025_v41 = vadd.f32 %v1272_v12, %v1213_v13  ;;  %v1275_v22 = vadd.f32 %v1274_v57, %v1273_v61 }
 0x2da   : > { %v1246_v26 = vpack.c.bf16 %v1041_v54, %v1041_v54  ;;  %v1044_v49 = vadd.f32 %v1287_v58, %v1213_v13 }
 0x2db   : > { %v1242_v56 = vpack.c.bf16 %v1025_v41, %v1025_v41  ;;  %v1028_v32 = vadd.f32 %v1275_v22, %v1213_v13 }
 0x2dc   : > { %1086 = vst.msk [vmem:[%s2062_s20 + $0x18] sm:$0xf] %vm1079_vm4, %v1246_v26  ;;  %v1247_v31 = vpack.c.bf16 %v1044_v49, %v1044_v49 }
 0x2dd   : > { %1082 = vst.msk [vmem:[%s2062_s20 + $0x8] sm:$0xf] %vm1079_vm4, %v1242_v56  ;;  %v1243_v24 = vpack.c.bf16 %v1028_v32, %v1028_v32 }
 0x2de   : > { %1087 = vst.msk [vmem:[%s2062_s20 + $0x1c] sm:$0xf] %vm1079_vm4, %v1247_v31 }
 0x2df   : > { %1083 = vst.msk [vmem:[%s2062_s20 + $0xc] sm:$0xf] %vm1079_vm4, %v1243_v24 }
 0x2e0 PF: > { %s17_s19 = sadd.s32 1, %s1514_s19   ;;  %s2134_s12 = smov %s1490_s13 }
 0x2e1   : > { %p14_p2 = scmp.ge.s32.totalorder %s17_s19, 10   ;;  %s2135_s13 = smov %s1494_s14 }
 0x2e2   : > { %s2136_s14 = smov %s1624_s4  ;;  %s2137_s15 = smov %s1506_s17 }
 0x2e3   : > { %s2138_s16 = smov %s1510_s18  ;;  %s2139_s17 = smov %s2142_s21 }
 0x2e4   : > { %s2140_s18 = smov %s2146_s22  ;;  %16 = sbr.rel (!%p14_p2) target bundleno = 8 (0x8), region = 96 }
 0x2eb   :  { %1118 = vsyncpa [#allocation5], 1 }
 0x2ec   :  { %1120 = vsyncpa [#allocation5 + $0x1], 1 }
 0x2ed   :  { %1121 = vsyncpa [#allocation7], 1 }

</bundles_post_ra>
